<compile_context>
chip_gen: v5e
topology: v5e:2x2
jax: 0.10.0
libtpu: 0.0.40
codegen_flags: <defaults>
</compile_context>

<pallas_src>
import functools

import jax
import jax.numpy as jnp
from jax import lax
from jax.experimental import pallas as pl
from jax.experimental.pallas import tpu as pltpu


def _round_up(x, m):
    return -(-x // m) * m


# -----------------------------------------------------------------------------
# Fused ConvSequence kernel: one (batch, time-tile) grid step computes all
# `depth` dilated conv layers (bias + ReLU) entirely in VMEM.  All inputs are
# auto-pipelined by BlockSpec (no manual DMA).
# -----------------------------------------------------------------------------
def _fused_convseq_kernel(core_ref, halo_ref, emb_ref, *rest, depth,
                          kernel_size, dilations, halos, time_tile, true_len,
                          emb_dim, tap_path, ctr_pads):
    w_refs = rest[:depth]               # per-layer weights (layout per path)
    b_refs = rest[depth:2 * depth]      # per-layer (Cout, 1) f32 biases
    o_ref = rest[2 * depth]             # (1, Cout_last_padded, TT)

    t = pl.program_id(1)
    K = kernel_size
    H0 = halos[0]
    TT = time_tile
    L0 = TT + 2 * H0
    dtype = core_ref.dtype

    # Column validity for the full layer-0 window, computed ONCE per tile and
    # sliced per layer (positions outside [0, T) must stay zero so the fused
    # composition matches PyTorch's per-layer zero "same" padding).
    pos0 = lax.broadcasted_iota(jnp.int32, (1, L0), 1) + (t * TT - H0)
    valid0 = (pos0 >= 0) & (pos0 < true_len)                     # (1, L0)

    # Layer-0 input = [left halo | core | right halo] meg rows  ++  embedding
    # rows (constant over time, masked outside [0, T)).  The meg data outside
    # [0, T) is already zero via the one-time HBM padding.
    halo = halo_ref[0, 0]                                        # (Cmeg, 2*H0)
    meg0 = jnp.concatenate([halo[:, :H0], core_ref[0], halo[:, H0:]], axis=1)
    emb_rows = jnp.where(
        valid0,
        jnp.broadcast_to(emb_ref[0], (emb_dim, L0)).astype(dtype),
        jnp.zeros((), dtype))
    x = jnp.concatenate([meg0, emb_rows], axis=0)                # (C0, L0)

    length = L0
    for l in range(depth):
        d = dilations[l]
        pad = (K // 2) * d
        out_len = length - 2 * pad
        if tap_path[l]:
            # Per-tap accumulating matmuls (no stacked VMEM buffer); weights
            # are laid out (K, Cout, Cin) so w_refs[l][k] is a contiguous tile.
            y = jnp.dot(w_refs[l][0], x[:, 0:out_len],
                        preferred_element_type=jnp.float32)
            for k in range(1, K):
                y = y + jnp.dot(w_refs[l][k], x[:, k * d:k * d + out_len],
                                preferred_element_type=jnp.float32)
        else:
            # Small-Cin path: one deep matmul over the K stacked taps.
            pieces = [x[:, k * d:k * d + out_len] for k in range(K)]
            if ctr_pads[l]:
                pieces.append(jnp.zeros((ctr_pads[l], out_len), dtype))
            stacked = jnp.concatenate(pieces, axis=0)            # (ctr, out_len)
            y = jnp.dot(w_refs[l][...], stacked,
                        preferred_element_type=jnp.float32)
        y = y + b_refs[l][...]                                   # f32 bias add
        if l == depth - 1:
            o_ref[0] = y.astype(o_ref.dtype)                     # no ReLU last
        else:
            y = jnp.maximum(y, 0.0)
            off = H0 - halos[l + 1]
            y = jnp.where(valid0[:, off:off + out_len], y, 0.0)
            x = y.astype(dtype)
        length = out_len


# -----------------------------------------------------------------------------
# Parameters: raw PyTorch-style init + one-time layout prep (hoisted).
# -----------------------------------------------------------------------------
def init_simpleconv_params(key, *, in_ch_meg, hidden, out_channels, depth,
                           kernel_size, n_subjects, subject_dim):
    params = {}
    key, k_emb = jax.random.split(key)
    params["subject_embedding"] = 0.1 * jax.random.normal(
        k_emb, (n_subjects, subject_dim), jnp.float32)

    sizes = [in_ch_meg + subject_dim] + [hidden] * depth
    sizes[-1] = out_channels
    convs = []
    for cin, cout in zip(sizes[:-1], sizes[1:]):
        key, kw, kb = jax.random.split(key, 3)
        fan_in = cin * kernel_size
        bound = 1.0 / jnp.sqrt(fan_in)
        w = jax.random.uniform(kw, (cout, cin, kernel_size), jnp.float32,
                               -bound, bound)
        b = jax.random.uniform(kb, (cout,), jnp.float32, -bound, bound)
        convs.append({"w": w, "b": b})
    params["convs"] = convs
    return params


def prepare_simpleconv_params(params, *, compute_dtype=jnp.float32,
                              cout_multiple=8, tap_cin_threshold=128):
    """One-time layout prep.

    Per layer, statically choose the matmul path by Cin:
      * Cin >= tap_cin_threshold : weights stored (K, Cout, Cin) for per-tap
        accumulating matmuls (no stacked VMEM copy in the kernel),
      * Cin <  tap_cin_threshold : weights stored (Cout, K*Cin) [+ zero-column
        padding so the contraction dim is a multiple of 16 (bf16) / 8 (f32)].
    Biases are kept as separate (Cout, 1) float32 vectors (post-matmul add).
    The last layer's Cout is padded up to a multiple of 8 (sliced afterwards).
    """
    convs = params["convs"]
    depth = len(convs)
    is_bf16 = jnp.dtype(compute_dtype) == jnp.dtype(jnp.bfloat16)
    ctr_mult = 16 if is_bf16 else 8

    w_preps, b_vecs, tap_path, ctr_pads = [], [], [], []
    for i, layer in enumerate(convs):
        w, b = layer["w"], layer["b"]
        cout, cin, k = w.shape
        is_last = (i == depth - 1)
        cout_p = _round_up(cout, cout_multiple) if is_last else cout

        b_vec = b.astype(jnp.float32)
        if cout_p != cout:
            b_vec = jnp.pad(b_vec, (0, cout_p - cout))
        b_vecs.append(b_vec.reshape(cout_p, 1))

        use_tap = cin >= tap_cin_threshold
        tap_path.append(use_tap)
        if use_tap:
            w_t = jnp.transpose(w, (2, 0, 1))                     # (K,Cout,Cin)
            if cout_p != cout:
                w_t = jnp.pad(w_t, ((0, 0), (0, cout_p - cout), (0, 0)))
            w_preps.append(w_t.astype(compute_dtype))
            ctr_pads.append(0)
        else:
            w_flat = jnp.transpose(w, (0, 2, 1)).reshape(cout, k * cin)
            ctr = _round_up(k * cin, ctr_mult)
            pad_cols = ctr - k * cin
            if pad_cols:
                w_flat = jnp.pad(w_flat, ((0, 0), (0, pad_cols)))
            if cout_p != cout:
                w_flat = jnp.pad(w_flat, ((0, cout_p - cout), (0, 0)))
            w_preps.append(w_flat.astype(compute_dtype))
            ctr_pads.append(pad_cols)

    return {
        "emb_table": params["subject_embedding"].astype(compute_dtype),
        "w_flats": tuple(w_preps),
        "b_vecs": tuple(b_vecs),
        "tap_path": tuple(tap_path),
        "ctr_pads": tuple(ctr_pads),
        "out_channels": convs[-1]["w"].shape[0],
        "kernel_size": convs[0]["w"].shape[2],
        "compute_dtype": compute_dtype,
    }


def _const_spec(shape):
    """Full-array BlockSpec with a constant index map; single-buffered when the
    installed JAX supports pipeline_mode=pl.Buffered(1) (weights never change
    across the grid, so the second pipeline buffer is pure VMEM waste)."""
    n = len(shape)
    idx = lambda *_args: (0,) * n
    if hasattr(pl, "Buffered"):
        try:
            return pl.BlockSpec(shape, idx, pipeline_mode=pl.Buffered(1))
        except TypeError:
            pass
    return pl.BlockSpec(shape, idx)


# -----------------------------------------------------------------------------
# Forward pass.
# -----------------------------------------------------------------------------
def simpleconv_forward(prepped, meg, subject_index, *, dilation_growth,
                       embedding_scale=1.0, time_tile=1024):
    w_flats = prepped["w_flats"]
    b_vecs = prepped["b_vecs"]
    tap_path = prepped["tap_path"]
    ctr_pads = prepped["ctr_pads"]
    depth = len(w_flats)
    K = prepped["kernel_size"]
    cdtype = prepped["compute_dtype"]

    B, c_meg, T = meg.shape
    dilations = tuple(int(dilation_growth) ** l for l in range(depth))
    pads = tuple((K // 2) * d for d in dilations)
    halos = [0] * (depth + 1)
    for l in range(depth - 1, -1, -1):
        halos[l] = halos[l + 1] + pads[l]
    halos = tuple(halos)
    H0 = halos[0]
    assert H0 > 0, "kernel_size must be >= 3 (module asserts odd kernel)"

    # Time tiling: single tile for small T, 128-aligned tiles otherwise.
    if T <= time_tile:
        TT = T
    else:
        TT = _round_up(time_tile, 128)
    t_round = _round_up(T, TT)
    n_t = t_round // TT
    L0 = TT + 2 * H0

    # One-time HBM prep (all auto-pipelined afterwards): tail-padded core plus
    # thin per-tile halo strips (left H0 + right H0, zero where out of range).
    padded = jnp.pad(meg.astype(cdtype),
                     ((0, 0), (0, 0), (H0, H0 + t_round - T)))
    core = lax.slice_in_dim(padded, H0, H0 + t_round, axis=2)    # (B,C,t_round)
    halo_strips = []
    for t in range(n_t):
        left = lax.slice_in_dim(padded, t * TT, t * TT + H0, axis=2)
        right = lax.slice_in_dim(padded, H0 + (t + 1) * TT,
                                 H0 + (t + 1) * TT + H0, axis=2)
        halo_strips.append(jnp.concatenate([left, right], axis=2))
    halo_arr = jnp.stack(halo_strips, axis=1)                    # (B,n_t,C,2H0)

    # Tiny embedding lookup; broadcast + concat happen inside the kernel.
    emb = (prepped["emb_table"][subject_index] * embedding_scale)[:, :, None]
    emb = emb.astype(cdtype)                                      # (B, D, 1)
    emb_dim = emb.shape[1]
    cout_pad = b_vecs[-1].shape[0]

    kern = functools.partial(
        _fused_convseq_kernel, depth=depth, kernel_size=K, dilations=dilations,
        halos=halos, time_tile=TT, true_len=T, emb_dim=emb_dim,
        tap_path=tap_path, ctr_pads=ctr_pads)

    in_specs = [
        pl.BlockSpec((1, c_meg, TT), lambda b, t: (b, 0, t)),        # core
        pl.BlockSpec((1, 1, c_meg, 2 * H0), lambda b, t: (b, t, 0, 0)),  # halos
        pl.BlockSpec((1, emb_dim, 1), lambda b, t: (b, 0, 0)),       # embedding
    ]
    in_specs += [_const_spec(w.shape) for w in w_flats]
    in_specs += [_const_spec(bv.shape) for bv in b_vecs]

    # VMEM estimate -> explicit, generation-aware limit only when needed.
    itemsize = jnp.dtype(cdtype).itemsize
    out_isz = jnp.dtype(meg.dtype).itemsize
    est = 2 * (c_meg * TT + c_meg * 2 * H0 + emb_dim) * itemsize
    est += 2 * cout_pad * TT * out_isz
    est += sum(2 * w.size * itemsize for w in w_flats)
    est += sum(2 * bv.size * 4 for bv in b_vecs)
    length, cin = L0, c_meg + emb_dim
    for l in range(depth):
        out_len = length - 2 * pads[l]
        cout = b_vecs[l].shape[0]
        est += cin * length * itemsize                      # layer input
        if not tap_path[l]:
            est += (K * cin + ctr_pads[l]) * out_len * itemsize   # stacked
        est += cout * out_len * 4                           # f32 accumulator
        length, cin = out_len, cout
    vmem_limit = None
    if est > (12 << 20):
        try:
            vmem_cap = int(getattr(pltpu.get_tpu_info(),
                                   "vmem_capacity_bytes", 128 << 20))
        except Exception:
            vmem_cap = 128 << 20
        hard_cap = min(48 << 20, max(16 << 20, (vmem_cap * 5) // 8))
        vmem_limit = int(min(max(est * 3 // 2, 32 << 20), hard_cap))

    out = pl.pallas_call(
        kern,
        out_shape=jax.ShapeDtypeStruct((B, cout_pad, t_round), meg.dtype),
        grid=(B, n_t),
        in_specs=in_specs,
        out_specs=pl.BlockSpec((1, cout_pad, TT), lambda b, t: (b, 0, t)),
        compiler_params=pltpu.CompilerParams(
            dimension_semantics=("parallel", "parallel"),
            vmem_limit_bytes=vmem_limit),
    )(core, halo_arr, emb, *w_flats, *b_vecs)

    return out[:, :prepped["out_channels"], :T]


# -----------------------------------------------------------------------------
# Pure-JAX reference (lax conv) for a correctness check.
# -----------------------------------------------------------------------------
def _ref_forward(params, meg, subject_index, *, kernel_size, dilation_growth):
    B, C, T = meg.shape
    emb = params["subject_embedding"][subject_index]
    emb = jnp.broadcast_to(emb[:, :, None], (B, emb.shape[1], T))
    x = jnp.concatenate([meg, emb], axis=1)
    n_layers = len(params["convs"])
    dilation = 1
    for i, layer in enumerate(params["convs"]):
        pad = (kernel_size // 2) * dilation
        y = jax.lax.conv_general_dilated(
            x, layer["w"], window_strides=(1,), padding=[(pad, pad)],
            rhs_dilation=(dilation,),
            dimension_numbers=("NCH", "OIH", "NCH"))
        y = y + layer["b"][None, :, None]
        if i != n_layers - 1:
            y = jnp.maximum(y, 0.0)
        x = y
        dilation *= dilation_growth
    return x[:, :, :T]


if __name__ == "__main__":
    B, C_MEG, HIDDEN, OUT_CH, DEPTH = 2, 8, 32, 6, 4
    KERNEL, DIL_GROWTH = 5, 2
    N_SUBJECTS, SUBJECT_DIM = 8, 16

    key = jax.random.PRNGKey(0)
    key, k_x1, k_x2, k_s = jax.random.split(key, 4)
    subject_index = jax.random.randint(k_s, (B,), 0, N_SUBJECTS)

    raw = init_simpleconv_params(
        key, in_ch_meg=C_MEG, hidden=HIDDEN, out_channels=OUT_CH, depth=DEPTH,
        kernel_size=KERNEL, n_subjects=N_SUBJECTS, subject_dim=SUBJECT_DIM)

    # Test 1: small T (single tile), stacked-matmul path (Cin < threshold).
    T1 = 32
    meg1 = jax.random.normal(k_x1, (B, C_MEG, T1), jnp.float32)
    prepped1 = prepare_simpleconv_params(raw, compute_dtype=jnp.float32)
    out1 = jax.block_until_ready(
        simpleconv_forward(prepped1, meg1, subject_index,
                           dilation_growth=DIL_GROWTH))
    ref1 = _ref_forward(raw, meg1, subject_index, kernel_size=KERNEL,
                        dilation_growth=DIL_GROWTH)
    assert out1.shape == (B, OUT_CH, T1), out1.shape
    err1 = float(jnp.max(jnp.abs(out1 - ref1)))
    assert jnp.allclose(out1, ref1, atol=2e-3, rtol=2e-3), err1

    # Test 2: T > time_tile (multi-tile, halos across tile boundaries, ragged
    # tail) + per-tap matmul path (threshold lowered so every layer uses it).
    T2 = 300
    meg2 = jax.random.normal(k_x2, (B, C_MEG, T2), jnp.float32)
    prepped2 = prepare_simpleconv_params(raw, compute_dtype=jnp.float32,
                                         tap_cin_threshold=16)
    out2 = jax.block_until_ready(
        simpleconv_forward(prepped2, meg2, subject_index,
                           dilation_growth=DIL_GROWTH, time_tile=128))
    ref2 = _ref_forward(raw, meg2, subject_index, kernel_size=KERNEL,
                        dilation_growth=DIL_GROWTH)
    assert out2.shape == (B, OUT_CH, T2), out2.shape
    err2 = float(jnp.max(jnp.abs(out2 - ref2)))
    assert jnp.allclose(out2, ref2, atol=2e-3, rtol=2e-3), err2

    print("KERNEL_OK")
</pallas_src>

<mosaic_0001>
module attributes {stable_mosaic.version = 11 : i64} {
  func.func @_fused_convseq_kernel(%arg0: i32, %arg1: i32, %arg2: memref<1x8x32xf32, #tpu.memory_space<vmem>>, %arg3: memref<1x1x8x60xf32, #tpu.memory_space<vmem>>, %arg4: memref<1x16x1xf32, #tpu.memory_space<vmem>>, %arg5: memref<32x120xf32, #tpu.memory_space<vmem>>, %arg6: memref<32x160xf32, #tpu.memory_space<vmem>>, %arg7: memref<32x160xf32, #tpu.memory_space<vmem>>, %arg8: memref<8x160xf32, #tpu.memory_space<vmem>>, %arg9: memref<32x1xf32, #tpu.memory_space<vmem>>, %arg10: memref<32x1xf32, #tpu.memory_space<vmem>>, %arg11: memref<32x1xf32, #tpu.memory_space<vmem>>, %arg12: memref<8x1xf32, #tpu.memory_space<vmem>>, %arg13: memref<1x8x32xf32, #tpu.memory_space<vmem>>) attributes {dimension_semantics = [#tpu.dimension_semantics<parallel>, #tpu.dimension_semantics<parallel>], iteration_bounds = array<i64: 2, 1>, scalar_prefetch = 0 : i64, scratch_operands = 0 : i64, tpu.core_type = #tpu.core_type<tc>, window_params = [{transform_indices = @transform_0, window_bounds = array<i64: 1, 8, 32>}, {transform_indices = @transform_1, window_bounds = array<i64: 1, 1, 8, 60>}, {transform_indices = @transform_2, window_bounds = array<i64: 1, 16, 1>}, {pipeline_mode = #tpu.pipeline_mode<synchronous>, transform_indices = @transform_3, window_bounds = array<i64: 32, 120>}, {pipeline_mode = #tpu.pipeline_mode<synchronous>, transform_indices = @transform_4, window_bounds = array<i64: 32, 160>}, {pipeline_mode = #tpu.pipeline_mode<synchronous>, transform_indices = @transform_5, window_bounds = array<i64: 32, 160>}, {pipeline_mode = #tpu.pipeline_mode<synchronous>, transform_indices = @transform_6, window_bounds = array<i64: 8, 160>}, {pipeline_mode = #tpu.pipeline_mode<synchronous>, transform_indices = @transform_7, window_bounds = array<i64: 32, 1>}, {pipeline_mode = #tpu.pipeline_mode<synchronous>, transform_indices = @transform_8, window_bounds = array<i64: 32, 1>}, {pipeline_mode = #tpu.pipeline_mode<synchronous>, transform_indices = @transform_9, window_bounds = array<i64: 32, 1>}, {pipeline_mode = #tpu.pipeline_mode<synchronous>, transform_indices = @transform_10, window_bounds = array<i64: 8, 1>}, {transform_indices = @transform_11, window_bounds = array<i64: 1, 8, 32>}]} {
    %0 = tpu.iota {dimensions = array<i32: 1>} : vector<1x92xi32>
    %c32_i32 = arith.constant 32 : i32
    %1 = arith.muli %arg1, %c32_i32 : i32
    %c30_i32 = arith.constant 30 : i32
    %2 = arith.subi %1, %c30_i32 : i32
    %3 = vector.broadcast %2 : i32 to vector<1x92xi32>
    %4 = arith.addi %0, %3 : vector<1x92xi32>
    %c0_i32 = arith.constant 0 : i32
    %5 = vector.broadcast %c0_i32 : i32 to vector<1x92xi32>
    %6 = arith.cmpi sge, %4, %5 : vector<1x92xi32>
    %c32_i32_0 = arith.constant 32 : i32
    %7 = vector.broadcast %c32_i32_0 : i32 to vector<1x92xi32>
    %8 = arith.cmpi slt, %4, %7 : vector<1x92xi32>
    %9 = arith.andi %6, %8 : vector<1x92xi1>
    %c0 = arith.constant 0 : index
    %c0_1 = arith.constant 0 : index
    %c0_2 = arith.constant 0 : index
    %c0_3 = arith.constant 0 : index
    %10 = vector.load %arg3[%c0, %c0_1, %c0_2, %c0_3] : memref<1x1x8x60xf32, #tpu.memory_space<vmem>>, vector<1x1x8x60xf32>
    %11 = vector.shape_cast %10 : vector<1x1x8x60xf32> to vector<8x60xf32>
    %12 = vector.extract_strided_slice %11 {offsets = [0, 0], sizes = [8, 30], strides = [1, 1]} : vector<8x60xf32> to vector<8x30xf32>
    %c0_4 = arith.constant 0 : index
    %c0_5 = arith.constant 0 : index
    %c0_6 = arith.constant 0 : index
    %13 = vector.load %arg2[%c0_4, %c0_5, %c0_6] : memref<1x8x32xf32, #tpu.memory_space<vmem>>, vector<1x8x32xf32>
    %14 = vector.shape_cast %13 : vector<1x8x32xf32> to vector<8x32xf32>
    %15 = vector.extract_strided_slice %11 {offsets = [0, 30], sizes = [8, 30], strides = [1, 1]} : vector<8x60xf32> to vector<8x30xf32>
    %16 = tpu.concatenate %12, %14, %15 in 1 : vector<8x30xf32>, vector<8x32xf32>, vector<8x30xf32> -> vector<8x92xf32>
    %c0_7 = arith.constant 0 : index
    %c0_8 = arith.constant 0 : index
    %c0_9 = arith.constant 0 : index
    %17 = vector.load %arg4[%c0_7, %c0_8, %c0_9] : memref<1x16x1xf32, #tpu.memory_space<vmem>>, vector<1x16x1xf32>
    %18 = vector.shape_cast %17 : vector<1x16x1xf32> to vector<16x1xf32>
    %19 = vector.shape_cast %18 : vector<16x1xf32> to vector<16x1xf32>
    %20 = vector.broadcast %19 : vector<16x1xf32> to vector<16x92xf32>
    %cst = arith.constant 0.000000e+00 : f32
    %21 = vector.shape_cast %9 : vector<1x92xi1> to vector<1x92xi1>
    %22 = vector.broadcast %21 : vector<1x92xi1> to vector<16x92xi1>
    %23 = vector.broadcast %cst : f32 to vector<16x92xf32>
    %24 = arith.select %22, %20, %23 : vector<16x92xi1>, vector<16x92xf32>
    %25 = tpu.concatenate %16, %24 in 0 : vector<8x92xf32>, vector<16x92xf32> -> vector<24x92xf32>
    %26 = vector.extract_strided_slice %25 {offsets = [0, 0], sizes = [24, 88], strides = [1, 1]} : vector<24x92xf32> to vector<24x88xf32>
    %27 = vector.extract_strided_slice %25 {offsets = [0, 1], sizes = [24, 88], strides = [1, 1]} : vector<24x92xf32> to vector<24x88xf32>
    %28 = vector.extract_strided_slice %25 {offsets = [0, 2], sizes = [24, 88], strides = [1, 1]} : vector<24x92xf32> to vector<24x88xf32>
    %29 = vector.extract_strided_slice %25 {offsets = [0, 3], sizes = [24, 88], strides = [1, 1]} : vector<24x92xf32> to vector<24x88xf32>
    %30 = vector.extract_strided_slice %25 {offsets = [0, 4], sizes = [24, 88], strides = [1, 1]} : vector<24x92xf32> to vector<24x88xf32>
    %31 = tpu.concatenate %26, %27, %28, %29, %30 in 0 : vector<24x88xf32>, vector<24x88xf32>, vector<24x88xf32>, vector<24x88xf32>, vector<24x88xf32> -> vector<120x88xf32>
    %c0_10 = arith.constant 0 : index
    %c0_11 = arith.constant 0 : index
    %32 = vector.load %arg5[%c0_10, %c0_11] : memref<32x120xf32, #tpu.memory_space<vmem>>, vector<32x120xf32>
    %cst_12 = arith.constant dense<0.000000e+00> : vector<32x88xf32>
    %33 = tpu.matmul %32, %31, %cst_12 {dimension_numbers = #tpu.dot_dimension_numbers<[1], [0], [0], [1], [0, 0, 1, 1], [], []>} : vector<32x120xf32>, vector<120x88xf32>, vector<32x88xf32> -> vector<32x88xf32>
    %c0_13 = arith.constant 0 : index
    %c0_14 = arith.constant 0 : index
    %34 = vector.load %arg9[%c0_13, %c0_14] : memref<32x1xf32, #tpu.memory_space<vmem>>, vector<32x1xf32>
    %35 = vector.broadcast %34 : vector<32x1xf32> to vector<32x88xf32>
    %36 = arith.addf %33, %35 : vector<32x88xf32>
    %cst_15 = arith.constant 0.000000e+00 : f32
    %37 = vector.broadcast %cst_15 : f32 to vector<32x88xf32>
    %38 = arith.maximumf %36, %37 : vector<32x88xf32>
    %39 = vector.extract_strided_slice %9 {offsets = [0, 2], sizes = [1, 88], strides = [1, 1]} : vector<1x92xi1> to vector<1x88xi1>
    %cst_16 = arith.constant 0.000000e+00 : f32
    %40 = vector.shape_cast %39 : vector<1x88xi1> to vector<1x88xi1>
    %41 = vector.broadcast %40 : vector<1x88xi1> to vector<32x88xi1>
    %42 = vector.broadcast %cst_16 : f32 to vector<32x88xf32>
    %43 = arith.select %41, %38, %42 : vector<32x88xi1>, vector<32x88xf32>
    %44 = vector.extract_strided_slice %43 {offsets = [0, 0], sizes = [32, 80], strides = [1, 1]} : vector<32x88xf32> to vector<32x80xf32>
    %45 = vector.extract_strided_slice %43 {offsets = [0, 2], sizes = [32, 80], strides = [1, 1]} : vector<32x88xf32> to vector<32x80xf32>
    %46 = vector.extract_strided_slice %43 {offsets = [0, 4], sizes = [32, 80], strides = [1, 1]} : vector<32x88xf32> to vector<32x80xf32>
    %47 = vector.extract_strided_slice %43 {offsets = [0, 6], sizes = [32, 80], strides = [1, 1]} : vector<32x88xf32> to vector<32x80xf32>
    %48 = vector.extract_strided_slice %43 {offsets = [0, 8], sizes = [32, 80], strides = [1, 1]} : vector<32x88xf32> to vector<32x80xf32>
    %49 = tpu.concatenate %44, %45, %46, %47, %48 in 0 : vector<32x80xf32>, vector<32x80xf32>, vector<32x80xf32>, vector<32x80xf32>, vector<32x80xf32> -> vector<160x80xf32>
    %c0_17 = arith.constant 0 : index
    %c0_18 = arith.constant 0 : index
    %50 = vector.load %arg6[%c0_17, %c0_18] : memref<32x160xf32, #tpu.memory_space<vmem>>, vector<32x160xf32>
    %cst_19 = arith.constant dense<0.000000e+00> : vector<32x80xf32>
    %51 = tpu.matmul %50, %49, %cst_19 {dimension_numbers = #tpu.dot_dimension_numbers<[1], [0], [0], [1], [0, 0, 1, 1], [], []>} : vector<32x160xf32>, vector<160x80xf32>, vector<32x80xf32> -> vector<32x80xf32>
    %c0_20 = arith.constant 0 : index
    %c0_21 = arith.constant 0 : index
    %52 = vector.load %arg10[%c0_20, %c0_21] : memref<32x1xf32, #tpu.memory_space<vmem>>, vector<32x1xf32>
    %53 = vector.broadcast %52 : vector<32x1xf32> to vector<32x80xf32>
    %54 = arith.addf %51, %53 : vector<32x80xf32>
    %cst_22 = arith.constant 0.000000e+00 : f32
    %55 = vector.broadcast %cst_22 : f32 to vector<32x80xf32>
    %56 = arith.maximumf %54, %55 : vector<32x80xf32>
    %57 = vector.extract_strided_slice %9 {offsets = [0, 6], sizes = [1, 80], strides = [1, 1]} : vector<1x92xi1> to vector<1x80xi1>
    %cst_23 = arith.constant 0.000000e+00 : f32
    %58 = vector.shape_cast %57 : vector<1x80xi1> to vector<1x80xi1>
    %59 = vector.broadcast %58 : vector<1x80xi1> to vector<32x80xi1>
    %60 = vector.broadcast %cst_23 : f32 to vector<32x80xf32>
    %61 = arith.select %59, %56, %60 : vector<32x80xi1>, vector<32x80xf32>
    %62 = vector.extract_strided_slice %61 {offsets = [0, 0], sizes = [32, 64], strides = [1, 1]} : vector<32x80xf32> to vector<32x64xf32>
    %63 = vector.extract_strided_slice %61 {offsets = [0, 4], sizes = [32, 64], strides = [1, 1]} : vector<32x80xf32> to vector<32x64xf32>
    %64 = vector.extract_strided_slice %61 {offsets = [0, 8], sizes = [32, 64], strides = [1, 1]} : vector<32x80xf32> to vector<32x64xf32>
    %65 = vector.extract_strided_slice %61 {offsets = [0, 12], sizes = [32, 64], strides = [1, 1]} : vector<32x80xf32> to vector<32x64xf32>
    %66 = vector.extract_strided_slice %61 {offsets = [0, 16], sizes = [32, 64], strides = [1, 1]} : vector<32x80xf32> to vector<32x64xf32>
    %67 = tpu.concatenate %62, %63, %64, %65, %66 in 0 : vector<32x64xf32>, vector<32x64xf32>, vector<32x64xf32>, vector<32x64xf32>, vector<32x64xf32> -> vector<160x64xf32>
    %c0_24 = arith.constant 0 : index
    %c0_25 = arith.constant 0 : index
    %68 = vector.load %arg7[%c0_24, %c0_25] : memref<32x160xf32, #tpu.memory_space<vmem>>, vector<32x160xf32>
    %cst_26 = arith.constant dense<0.000000e+00> : vector<32x64xf32>
    %69 = tpu.matmul %68, %67, %cst_26 {dimension_numbers = #tpu.dot_dimension_numbers<[1], [0], [0], [1], [0, 0, 1, 1], [], []>} : vector<32x160xf32>, vector<160x64xf32>, vector<32x64xf32> -> vector<32x64xf32>
    %c0_27 = arith.constant 0 : index
    %c0_28 = arith.constant 0 : index
    %70 = vector.load %arg11[%c0_27, %c0_28] : memref<32x1xf32, #tpu.memory_space<vmem>>, vector<32x1xf32>
    %71 = vector.broadcast %70 : vector<32x1xf32> to vector<32x64xf32>
    %72 = arith.addf %69, %71 : vector<32x64xf32>
    %cst_29 = arith.constant 0.000000e+00 : f32
    %73 = vector.broadcast %cst_29 : f32 to vector<32x64xf32>
    %74 = arith.maximumf %72, %73 : vector<32x64xf32>
    %75 = vector.extract_strided_slice %9 {offsets = [0, 14], sizes = [1, 64], strides = [1, 1]} : vector<1x92xi1> to vector<1x64xi1>
    %cst_30 = arith.constant 0.000000e+00 : f32
    %76 = vector.shape_cast %75 : vector<1x64xi1> to vector<1x64xi1>
    %77 = vector.broadcast %76 : vector<1x64xi1> to vector<32x64xi1>
    %78 = vector.broadcast %cst_30 : f32 to vector<32x64xf32>
    %79 = arith.select %77, %74, %78 : vector<32x64xi1>, vector<32x64xf32>
    %80 = vector.extract_strided_slice %79 {offsets = [0, 0], sizes = [32, 32], strides = [1, 1]} : vector<32x64xf32> to vector<32x32xf32>
    %81 = vector.extract_strided_slice %79 {offsets = [0, 8], sizes = [32, 32], strides = [1, 1]} : vector<32x64xf32> to vector<32x32xf32>
    %82 = vector.extract_strided_slice %79 {offsets = [0, 16], sizes = [32, 32], strides = [1, 1]} : vector<32x64xf32> to vector<32x32xf32>
    %83 = vector.extract_strided_slice %79 {offsets = [0, 24], sizes = [32, 32], strides = [1, 1]} : vector<32x64xf32> to vector<32x32xf32>
    %84 = vector.extract_strided_slice %79 {offsets = [0, 32], sizes = [32, 32], strides = [1, 1]} : vector<32x64xf32> to vector<32x32xf32>
    %85 = tpu.concatenate %80, %81, %82, %83, %84 in 0 : vector<32x32xf32>, vector<32x32xf32>, vector<32x32xf32>, vector<32x32xf32>, vector<32x32xf32> -> vector<160x32xf32>
    %c0_31 = arith.constant 0 : index
    %c0_32 = arith.constant 0 : index
    %86 = vector.load %arg8[%c0_31, %c0_32] : memref<8x160xf32, #tpu.memory_space<vmem>>, vector<8x160xf32>
    %cst_33 = arith.constant dense<0.000000e+00> : vector<8x32xf32>
    %87 = tpu.matmul %86, %85, %cst_33 {dimension_numbers = #tpu.dot_dimension_numbers<[1], [0], [0], [1], [0, 0, 1, 1], [], []>} : vector<8x160xf32>, vector<160x32xf32>, vector<8x32xf32> -> vector<8x32xf32>
    %c0_34 = arith.constant 0 : index
    %c0_35 = arith.constant 0 : index
    %88 = vector.load %arg12[%c0_34, %c0_35] : memref<8x1xf32, #tpu.memory_space<vmem>>, vector<8x1xf32>
    %89 = vector.broadcast %88 : vector<8x1xf32> to vector<8x32xf32>
    %90 = arith.addf %87, %89 : vector<8x32xf32>
    %c0_36 = arith.constant 0 : index
    %c0_37 = arith.constant 0 : index
    %c0_38 = arith.constant 0 : index
    %91 = vector.load %arg13[%c0_36, %c0_37, %c0_38] : memref<1x8x32xf32, #tpu.memory_space<vmem>>, vector<1x8x32xf32>
    %92 = vector.shape_cast %91 : vector<1x8x32xf32> to vector<8x32xf32>
    %93 = vector.shape_cast %90 : vector<8x32xf32> to vector<1x8x32xf32>
    tpu.vector_store %arg13[%c0_36, %c0_37, %c0_38], %93 {strides = array<i32>} : memref<1x8x32xf32, #tpu.memory_space<vmem>>, vector<1x8x32xf32>,
    return
  }
  func.func @transform_0(%arg0: i32, %arg1: i32) -> (i32, i32, i32) {
    %c0_i32 = arith.constant 0 : i32
    %c0_i32_0 = arith.constant 0 : i32
    return %arg0, %c0_i32, %arg1 : i32, i32, i32
  }
  func.func @transform_1(%arg0: i32, %arg1: i32) -> (i32, i32, i32, i32) {
    %c0_i32 = arith.constant 0 : i32
    %c0_i32_0 = arith.constant 0 : i32
    %c0_i32_1 = arith.constant 0 : i32
    return %arg0, %arg1, %c0_i32, %c0_i32_0 : i32, i32, i32, i32
  }
  func.func @transform_2(%arg0: i32, %arg1: i32) -> (i32, i32, i32) {
    %c0_i32 = arith.constant 0 : i32
    %c0_i32_0 = arith.constant 0 : i32
    %c0_i32_1 = arith.constant 0 : i32
    return %arg0, %c0_i32, %c0_i32_0 : i32, i32, i32
  }
  func.func @transform_3(%arg0: i32, %arg1: i32) -> (i32, i32) {
    %c0_i32 = arith.constant 0 : i32
    %c0_i32_0 = arith.constant 0 : i32
    %c0_i32_1 = arith.constant 0 : i32
    return %c0_i32, %c0_i32_0 : i32, i32
  }
  func.func @transform_4(%arg0: i32, %arg1: i32) -> (i32, i32) {
    %c0_i32 = arith.constant 0 : i32
    %c0_i32_0 = arith.constant 0 : i32
    %c0_i32_1 = arith.constant 0 : i32
    return %c0_i32, %c0_i32_0 : i32, i32
  }
  func.func @transform_5(%arg0: i32, %arg1: i32) -> (i32, i32) {
    %c0_i32 = arith.constant 0 : i32
    %c0_i32_0 = arith.constant 0 : i32
    %c0_i32_1 = arith.constant 0 : i32
    return %c0_i32, %c0_i32_0 : i32, i32
  }
  func.func @transform_6(%arg0: i32, %arg1: i32) -> (i32, i32) {
    %c0_i32 = arith.constant 0 : i32
    %c0_i32_0 = arith.constant 0 : i32
    %c0_i32_1 = arith.constant 0 : i32
    return %c0_i32, %c0_i32_0 : i32, i32
  }
  func.func @transform_7(%arg0: i32, %arg1: i32) -> (i32, i32) {
    %c0_i32 = arith.constant 0 : i32
    %c0_i32_0 = arith.constant 0 : i32
    %c0_i32_1 = arith.constant 0 : i32
    return %c0_i32, %c0_i32_0 : i32, i32
  }
  func.func @transform_8(%arg0: i32, %arg1: i32) -> (i32, i32) {
    %c0_i32 = arith.constant 0 : i32
    %c0_i32_0 = arith.constant 0 : i32
    %c0_i32_1 = arith.constant 0 : i32
    return %c0_i32, %c0_i32_0 : i32, i32
  }
  func.func @transform_9(%arg0: i32, %arg1: i32) -> (i32, i32) {
    %c0_i32 = arith.constant 0 : i32
    %c0_i32_0 = arith.constant 0 : i32
    %c0_i32_1 = arith.constant 0 : i32
    return %c0_i32, %c0_i32_0 : i32, i32
  }
  func.func @transform_10(%arg0: i32, %arg1: i32) -> (i32, i32) {
    %c0_i32 = arith.constant 0 : i32
    %c0_i32_0 = arith.constant 0 : i32
    %c0_i32_1 = arith.constant 0 : i32
    return %c0_i32, %c0_i32_0 : i32, i32
  }
  func.func @transform_11(%arg0: i32, %arg1: i32) -> (i32, i32, i32) {
    %c0_i32 = arith.constant 0 : i32
    %c0_i32_0 = arith.constant 0 : i32
    return %arg0, %c0_i32, %arg1 : i32, i32, i32
  }
}

</mosaic_0001>

<bundles_post_ra>
// kernel: tpu_custom_call.1
= control target key start
LH: loop header
LB: loop body
LE: loop exit
PB: predicated region body
PF: predicated region fallthrough
CT: control target
= control target key end

     0   :  { %s2531_s0 = inlined_call_operand.hbm [shape: f32[2,8,32], index: 0, kind: input, shape index: {}]   ;;  %s2532_s1 = inlined_call_operand.hbm [shape: f32[2,1,8,60], index: 1, kind: input, shape index: {}]   ;;  %s2533_s2 = inlined_call_operand.vmem [shape: f32[2,16,1], index: 2, kind: input, shape index: {}]   ;;  %s2534_s3 = inlined_call_operand.hbm [shape: f32[32,120], index: 3, kind: input, shape index: {}]   ;;  %s2535_s4 = inlined_call_operand.vmem [shape: f32[32,160], index: 4, kind: input, shape index: {}]   ;;  %s2536_s5 = inlined_call_operand.vmem [shape: f32[32,160], index: 5, kind: input, shape index: {}]   ;;  %s2537_s6 = inlined_call_operand.hbm [shape: f32[8,160], index: 6, kind: input, shape index: {}]   ;;  %s2538_s7 = inlined_call_operand.vmem [shape: f32[32,1], index: 7, kind: input, shape index: {}]   ;;  %s2539_s8 = inlined_call_operand.vmem [shape: f32[32,1], index: 8, kind: input, shape index: {}]   ;;  %s2540_s9 = inlined_call_operand.vmem [shape: f32[32,1], index: 9, kind: input, shape index: {}]   ;;  %s2541_s10 = inlined_call_operand.vmem [shape: f32[8,1], index: 10, kind: input, shape index: {}]   ;;  %s2542_s11 = inlined_call_operand.hbm [shape: f32[2,8,32], index: 11, kind: output, shape index: {}]  }
   0x1   :  { %2552 = sst [smem:[#allocation23_spill]] %s2534_s3 }
   0x2   :  { %2553 = sst [smem:[#allocation24_spill]] %s2536_s5 }
   0x3   :  { %2554 = sst [smem:[#allocation25_spill]] %s2537_s6 }
   0x4   :  { %2555 = sst [smem:[#allocation26_spill]] %s2541_s10 }
   0x5   :  { %2556 = sst [smem:[#allocation27_spill]] %s2542_s11 }
   0x6   :  { %16 = vsyncpa [#allocation3], 0 }
   0x7   :  { %18 = vsyncpa [#allocation3 + $0x1], 0 }
   0x8   :  { %19 = vsyncpa [#allocation6], 0 }
   0x9   :  { %21 = vsyncpa [#allocation6 + $0x1], 0 }
   0xa   :  { %22 = vsyncpa [#allocation9], 0 }
   0xb   :  { %23 = vsyncpa [#allocation4], 0 }
   0xc   :  { %25 = vsyncpa [#allocation4 + $0x1], 0  ;;  %s2178_s17 = smov 0   ;;  %s2180_s18 = smov 0  }
   0xd   :  { %s2182_s19 = smov 0   ;;  %s2184_s20 = smov 0  }
   0xe   :  { %s2186_s21 = smov 0   ;;  %s2188_s22 = smov 0  }
   0xf LB: > { %2557 = sst [smem:[#allocation16_spill]] %s2075_s17  ;;  %s2209_s23 = sadd.s32 4294967295, %s2095_s22   ;;  %s2095_s22 = sphi %s2188_s22, %s31_s22   ;;  %s2091_s21 = sphi %s2186_s21, %s2582_s21   ;;  %s2087_s20 = sphi %s2184_s20, %s2581_s20   ;;  %s2083_s19 = sphi %s2182_s19, %s2580_s19   ;;  %s2079_s18 = sphi %s2180_s18, %s2584_s18   ;;  %s2075_s17 = sphi %s2178_s17, %s2583_s17  }
  0x10   : > { %2558 = sst [smem:[#allocation17_spill]] %s2083_s19  ;;  %p1425_p0 = scmp.ge.s32.totalorder %s2095_s22, 1 }
  0x11   : > { %2559 = sst [smem:[#allocation18_spill]] %s2091_s21  ;;  %p66_p1 = scmp.eq.s32.totalorder %s2209_s23, 0 }
  0x12   : > { %p326_p2 = scmp.lt.s32.totalorder %s2095_s22, 3  ;;  %s2560_s3 = sld [smem:[#allocation23_spill]] }
  0x13   : > { %s2097_s28 = smov [#allocation7]   ;;  %p1428_p6 = scmp.ge.s32.totalorder %s2095_s22, 2 }
  0x14   : > { %p2217_p3 = pnand %p1425_p0, %p326_p2  ;;  %s339_s29 = sshll.u32 %s2097_s28, 4  ;;  %s340_s29 = int_to_ptr.vmem [resolvable:$true] %s339_s29 }
  0x15   : > { %s2562_s6 = sld [smem:[#allocation25_spill]]  ;;  %s2098_s14 = smov 128  }
  0x16   : > { %p1475_p4 = pneg %p2217_p3  ;;  %s2099_s15 = smov 8  }
  0x17   : > { %s2100_s16 = smov [#allocation8]   ;;  %s1424_s25 = sadd.s32 4294967294, %s2095_s22  }
  0x18   : > { %s337_s26 = sshll.u32 %s2560_s3, 4  ;;  %p1476_p5 = pnand %p1475_p4, %p66_p1  ;;  %s338_s26 = int_to_ptr.hbm [resolvable:$true] %s337_s26 }
  0x19   : > { %s360_s24 = sshll.u32 %s2100_s16, 4  ;;  %s43_s28 = sadd.s32 1, %s2091_s21  ;;  %s361_s24 = int_to_ptr.vmem [resolvable:$true] %s360_s24 }
  0x1a   : > { %1478 = dma.hbm_to_vmem [thread:$0]  (!%p1476_p5), %s338_s26, 512, %s340_s29, [#allocation6], %s2098_s14, %s2098_s14, %s2099_s15  }
  0x1b   : > { %s358_s13 = sshll.u32 %s2562_s6, 4  ;;  %p45_p7 = scmp.ge.s32.totalorder %s43_s28, 2  ;;  %s359_s13 = int_to_ptr.hbm [resolvable:$true] %s358_s13 }
  0x1c   : > { %1481 = dma.hbm_to_vmem [thread:$0]  (!%p1476_p5), %s359_s13, 256, %s361_s24, [#allocation9]  }
  0x1d   : > { %s52_s30 = sadd.s32 1, %s2083_s19  ;;  %p59_p8 = scmp.ne.s32.totalorder %s2083_s19, %s2079_s18 }
  0x1e   : > { %p60_p9 = scmp.eq.s32.totalorder %s2095_s22, 0  ;;  %s2586_s28 = smov (%p45_p7, %s43_s28), 0 }
  0x1f   : > { %2563 = sst [smem:[#allocation19_spill]] %s2586_s28  ;;  %p65_p11 = scmp.ne.s32.totalorder %s2079_s18, %s2075_s17 }
  0x20   : > { %p2237_p10 = por %p60_p9, %p59_p8  ;;  %s47_s29 = ssub.s32 %s2091_s21, %s2586_s28 }
  0x21   : > { %p313_p12 = scmp.eq.s32.totalorder %s2209_s23, 1  ;;  %p50_p13 = scmp.eq.s32.totalorder %s47_s29, 0 }
  0x22   : > { %p2248_p0 = por %p66_p1, %p65_p11  ;;  %p319_p4 = scmp.eq.s32.totalorder %s1424_s25, 1 }
  0x23   : > { %p2252_p2 = por %p313_p12, %p59_p8  ;;  %p1495_p7 = scmp.lt.s32.totalorder %s2095_s22, 2 }
  0x24   : > { %s2257_s14 = scalar_select %p50_p13, %s2083_s19, %s52_s30  }
  0x25   : > { %s2566_s13 = scalar_select %p2252_p2, 1, 0 }
  0x26   : > { %2568 = sst [smem:[#allocation21_spill]] %s2257_s14  ;;  %p2259_p5 = por %p319_p4, %p65_p11 }
  0x27   : > { %2567 = sst [smem:[#allocation20_spill]] %s2566_s13  ;;  %s383_s16 = sand.u32 1, %s2083_s19  }
  0x28   : > { %s2569_s15 = scalar_select %p2259_p5, 1, 0 }
  0x29   : > { %s1430_s24 = sshll.u32 %s2091_s21, 3  ;;  %s1429_s29 = sshll.u32 %s383_s16, 3 }
  0x2a   : > { %2570 = sst [smem:[#allocation22_spill]] %s2569_s15  ;;  %s392_s28 = scalar_lea.hbm %s2531_s0, %s1430_s24 }
  0x2b   : > { %s394_s17 = sshll.u32 %s392_s28, 4  ;;  %s387_s11 = scalar_lea.vmem [#allocation2], %s1429_s29  ;;  %s395_s17 = int_to_ptr.hbm [resolvable:$true] %s394_s17 }
  0x2c   : > { %s396_s10 = sshll.u32 %s387_s11, 4  ;;  %p1483_p8 = pnand %p1495_p7, %p2237_p10  ;;  %s397_s10 = int_to_ptr.vmem [resolvable:$true] %s396_s10 }
  0x2d   : > { %s412_s14 = scalar_lea.hbm %s2532_s1, %s1430_s24  ;;  %s403_s15 = sand.u32 1, %s2095_s22  }
  0x2e   : > { %s384_s13 = scalar_lea.sflag [#allocation3], %s383_s16  ;;  %s414_s21 = sshll.u32 %s412_s14, 4  ;;  %s415_s21 = int_to_ptr.hbm [resolvable:$true] %s414_s21 }
  0x2f   : > { %1485 = dma.hbm_to_vmem [thread:$0]  (!%p1483_p8), %s395_s17, 128, %s397_s10, %s384_s13  }
  0x30   : > { %s407_s19 = scalar_lea.vmem [#allocation5], %s1429_s29  ;;  %s404_s3 = scalar_lea.sflag [#allocation6], %s403_s15 }
  0x31   : > { %s416_s5 = sshll.u32 %s407_s19, 4  ;;  %433 = sbr.rel (%p2217_p3) target bundleno = 2047 (0x7ff), region = 64  ;;  %s417_s5 = int_to_ptr.vmem [resolvable:$true] %s416_s5 }
  0x32   : > { %1488 = dma.hbm_to_vmem [thread:$0]  (!%p1483_p8), %s415_s21, 128, %s417_s5, %s404_s3  }
  0x33   : > { %s2278_s6 = sand.u32 (!%p2217_p3), 1, %s2079_s18  }
  0x34   : > { %s2281_s11 = sshll.u32 (!%p2217_p3), %s2278_s6, 3  ;;  %s436_s10 = scalar_lea.sflag (!%p2217_p3), [#allocation3], %s2278_s6 }
  0x35   : > { %s439_s17 = scalar_lea.vmem (!%p2217_p3), [#allocation2], %s2281_s11 }
  0x36   : > { %2054 = dma.done.wait (%p2248_p0), %s436_s10, 128  }
  0x37   : > { %2056 = vsyncadd (%p2248_p0), %s436_s10, 4294967168  ;;  %s445_s5 = sand.u32 1, %s2209_s23   ;;  %s449_s21 = scalar_lea.vmem [#allocation5], %s2281_s11 }
  0x38   : > { %s446_s19 = scalar_lea.sflag [#allocation6], %s445_s5 }
  0x39   : > { %2058 = dma.done.wait (%p2248_p0), %s446_s19, 128  }
  0x3a   : > { %2060 = vsyncadd (%p2248_p0), %s446_s19, 4294967168 }
  0x3b   : > { %2062 = dma.done.wait (%p66_p1), [#allocation6], 512  }
  0x3c   : > { %2064 = vsyncadd (%p66_p1), [#allocation6], 4294966784 }
  0x3d   : > { %2066 = dma.done.wait (%p66_p1), [#allocation9], 256  }
  0x3e   : > { %2068 = vsyncadd (%p66_p1), [#allocation9], 4294967040  ;;  %p509_p3 = scmp.lt.s32.totalorder %s2087_s20, 1  ;;  %v2101_v0 = vmov 0   ;;  %v524_v2 = vld [vmem:[%s439_s17] sm:$0xff]  ;;  %s2102_s14 = smov 30   ;;  %v514_v5 = vlaneseq }
  0x3f   : > { %1568 = vset.pattern.permute.xlu0 %v2101_v0  ;;  %1589 = vset.pattern.permute.xlu1 %v2101_v0  ;;  %v523_v4 = vld [vmem:[%s449_s21] sm:$0xff]  ;;  %s2103_s23 = smov 32   ;;  %vm533_vm2 = vcmask 244736   ;;  %vm535_vm4 = vcmask 506880   ;;  %s2104_s15 = smov 125   ;;  %v596_v19 = vld [vmem:[%s2538_s7] sm:$0xff] }
  0x40   : > { %s510_s27 = scalar_select %p509_p3, %s2087_s20, 1  ;;  %1590 = vset.pattern.permute.xlu2 %v2101_v0  ;;  %526 = vrot.lane.b32.xlu1 %v524_v2, %s2102_s14  ;;  %v515_v6 = vand.u32 127, %v514_v5  ;;  %v599_v18 = vld [vmem:[%s2538_s7 + $0x18] sm:$0xff]  ;;  %v598_v36 = vld [vmem:[%s2538_s7 + $0x10] sm:$0xff]  ;;  %v597_v37 = vld [vmem:[%s2538_s7 + $0x8] sm:$0xff]  ;;  %vm620_vm5 = vcmask 982016  }
  0x41   : > { %s2105_s16 = smov 124   ;;  %s2106_s24 = smov 127   ;;  %v592_v38 = vld [vmem:[#allocation7] sm:$0xff]  ;;  %v593_v39 = vld [vmem:[#allocation7 + $0x8] sm:$0xff]  ;;  %v594_v40 = vld [vmem:[#allocation7 + $0x10] sm:$0xff]  ;;  %vm806_vm6 = vcmask 261120  }
  0x42   : > { %s1460_s28 = sshll.u32 %s510_s27, 4  ;;  %v519_v7 = vadd.s32 4294967266, %v515_v6  ;;  %s2107_s29 = smov 126   ;;  %v595_v41 = vld [vmem:[#allocation7 + $0x18] sm:$0xff] }
  0x43   : > { %s513_s13 = scalar_lea.vmem %s2533_s2, %s1460_s28  ;;  %s2108_s27 = smov 2  }
  0x44   : > { %v538_v1 = vld [vmem:[%s513_s13 + $0x8] sm:$0xff]  ;;  %v537_v3 = vld [vmem:[%s513_s13] sm:$0xff]  ;;  %vm520_vm0 = vcmp.ge.s32.totalorder %v519_v7, 0  ;;  %vm521_vm1 = vcmp.lt.s32.totalorder %v519_v7, 32  ;;  %s2109_s28 = smov 122   ;;  %s2110_s26 = smov 120  }
  0x45   : > { %546 = vperm.xlu0 %1568, %v538_v1   ;;  %vm2308_vm3 = vmand %vm520_vm0, %vm521_vm1  ;;  %s2112_s3 = smov 116   ;;  %s2113_s10 = smov 112  }
  0x46   : > { %s2115_s14 = smov 104   ;;  %s2574_s25 = sld [smem:[#allocation26_spill]] }
  0x47   : > { %s1457_s30 = sshll.u32 %s2087_s20, 3  ;;  %s508_s19 = scalar_lea.vmem [#allocation10], %s2281_s11 }
  0x48   : > { %530 = vrot.lane.b32.xlu1 %v523_v4, %s2103_s23  ;;  %s2573_s23 = sld [smem:[#allocation24_spill]]  ;;  %s1285_s21 = sshll.u32 %s508_s19, 4  ;;  %s1286_s21 = int_to_ptr.vmem [resolvable:$true] %s1285_s21 }
  0x49   : > { %s1272_s12 = scalar_lea.sflag [#allocation4], %s2278_s6 }
  0x4d   : > { %541 = vperm.xlu0 %1568, %v537_v3  }
  0xb2   : > { %v527_v9 = vpop.permute.xlu1 %526 }
  0xb3   : > { %v534_v11 = vsel %vm533_vm2, %v523_v4, %v527_v9 }
  0xb7   : > { %v547_v8 = vpop.permute.xlu0 %546 }
  0xb8   : > { %v552_v14 = vsel %vm2308_vm3, %v547_v8, 0.0 }
  0xba   : > { %v531_v13 = vpop.permute.xlu1 %530 }
  0xbb   : > { %v536_v16 = vsel %vm535_vm4, %v534_v11, %v531_v13 }
  0xbc   : > { %574 = vrot.lane.b32.xlu1 %v536_v16, %s2104_s15 }
  0xbf   : > { %v542_v12 = vpop.permute.xlu0 %541 }
  0xc0   : > { %v551_v15 = vsel %vm2308_vm3, %v542_v12, 0.0 }
  0xc1   : > { %v1574_v17 = vpack.i.bf16 %v551_v15, %v552_v14 }
  0xc3   : > { %1575 = vrot.lane.b32.xlu0 %v1574_v17, %s2104_s15  ;;  %1570 = vrot.lane.b32.xlu2 %v1574_v17, %s2105_s16  ;;  %s2116_s15 = smov 96  }
  0xc4   : > { %1585 = vrot.lane.b32.xlu1 %v1574_v17, %s2106_s24 }
  0xcb   : > { %565 = vrot.lane.b32.xlu0 %v536_v16, %s2107_s29  ;;  %583 = vrot.lane.b32.xlu2 %v536_v16, %s2105_s16 }
  0xcc   : > { %612 = vperm.xlu1 %1589, %v598_v36  }
  0xd3   : > { %617 = vperm.xlu0 %1568, %v599_v18   ;;  %1580 = vrot.lane.b32.xlu2 %v1574_v17, %s2107_s29 }
  0xdb   : > { %602 = vperm.xlu0 %1568, %v596_v19   ;;  %556 = vrot.lane.b32.xlu2 %v536_v16, %s2106_s24  ;;  %s2117_s24 = smov 114  }
  0xe3   : > { %607 = vperm.xlu2 %1590, %v597_v37  }
 0x11d   : > { %v1571_v20 = vpop.permute.xlu2 %1570 }
 0x11e   : > { %v1572_v21 = vunpack.i.l.bf16 %v1571_v20  ;;  %v1573_v22 = vunpack.i.h.bf16 %v1571_v20 }
 0x120   : > { %634 = vmatpush.msra.mxu0 %v1572_v21 }
 0x122   : > { %635 = vmatpush.msra.mxu0 %v1573_v22 }
 0x125   : > { %v584_v23 = vpop.permute.xlu2 %583 }
 0x126   : > { %636 = vmatpush.msra.mxu0 %v584_v23 }
 0x12d   : > { %v1581_v28 = vpop.permute.xlu2 %1580 }
 0x12e   : > { %v575_v24 = vpop.permute.xlu1 %574  ;;  %v1582_v29 = vunpack.i.l.bf16 %v1581_v28  ;;  %v1583_v30 = vunpack.i.h.bf16 %v1581_v28  ;;  %v730_v28 = vld [vmem:[%s2539_s8] sm:$0xff] }
 0x135   : > { %v1576_v25 = vpop.permute.xlu0 %1575  ;;  %v557_v35 = vpop.permute.xlu2 %556 }
 0x136   : > { %v1577_v26 = vunpack.i.l.bf16 %v1576_v25  ;;  %v1578_v27 = vunpack.i.h.bf16 %v1576_v25  ;;  %v1586_v31 = vpop.permute.xlu1 %1585  ;;  %v731_v25 = vld [vmem:[%s2539_s8 + $0x8] sm:$0xff] }
 0x137   : > { %v1587_v33 = vunpack.i.l.bf16 %v1586_v31  ;;  %v1588_v34 = vunpack.i.h.bf16 %v1586_v31 }
 0x138   : > { %637 = vmatpush.msra.mxu0 %v1577_v26  ;;  %v732_v26 = vld [vmem:[%s2539_s8 + $0x10] sm:$0xff] }
 0x13a   : > { %638 = vmatpush.msra.mxu0 %v1578_v27  ;;  %v733_v27 = vld [vmem:[%s2539_s8 + $0x18] sm:$0xff] }
 0x13c   : > { %639 = vmatpush.msra.mxu0 %v575_v24 }
 0x13d   : > { %v566_v32 = vpop.permute.xlu0 %565  ;;  %v608_v45 = vpop.permute.xlu2 %607 }
 0x13e   : > { %640 = vmatpush.msra.mxu0 %v1582_v29  ;;  %v613_v53 = vpop.permute.xlu1 %612 }
 0x140   : > { %641 = vmatpush.msra.mxu0 %v1583_v30 }
 0x142   : > { %642 = vmatpush.msra.mxu0 %v566_v32 }
 0x144   : > { %643 = vmatpush.msra.mxu0 %v1587_v33 }
 0x145   : > { %v618_v42 = vpop.permute.xlu0 %617 }
 0x146   : > { %644 = vmatpush.msra.mxu0 %v1588_v34 }
 0x148   : > { %645 = vmatpush.msra.mxu0 %v557_v35 }
 0x14a   : > { %1441 = vmatpush.msk.msra.mxu0 %vm2308_vm3, %v547_v8 }
 0x14c   : > { %1442 = vmatpush.msk.msra.mxu0 %vm2308_vm3, %v542_v12 }
 0x14d   : > { %v603_v44 = vpop.permute.xlu0 %602 }
 0x14e   : > { %648 = vmatpush.msra.mxu0 %v536_v16 }
 0x14f   : > { %1443 = vmatmul.msk.f32.vlgmr.msra.gmra.mxu0 %vm620_vm5, %v592_v38 }
 0x157   : > { %1444 = vmatmul.msk.f32.gmra.mxu0 %vm620_vm5, %v593_v39 }
 0x15f   : > { %1445 = vmatmul.msk.f32.gmra.mxu0 %vm620_vm5, %v594_v40 }
 0x167   : > { %1446 = vmatmul.msk.f32.gmra.mxu0 %vm620_vm5, %v595_v41 }
 0x1cc   : > { %v650_v43 = vpop.f32.mrf.mxu0 }
 0x1cd   : > { %v651_v46 = vadd.f32 %v650_v43, %v603_v44 }
 0x1cf   : > { %v662_v49 = vmax.f32 %v651_v46, 0.0 }
 0x1d4   : > { %v653_v47 = vpop.f32.mrf.mxu0 }
 0x1d5   : > { %v654_v48 = vadd.f32 %v653_v47, %v608_v45 }
 0x1d7   : > { %v663_v50 = vmax.f32 %v654_v48, 0.0 }
 0x1d9   : > { %v1596_v51 = vpack.i.bf16 %v662_v49, %v663_v50 }
 0x1db   : > { %1597 = vrot.lane.b32.xlu2 %v1596_v51, %s2108_s27 }
 0x1dc   : > { %v656_v52 = vpop.f32.mrf.mxu0 }
 0x1dd   : > { %v657_v54 = vadd.f32 %v656_v52, %v613_v53  ;;  %v723_v53 = vld [vmem:[%s2535_s4 + $0x8] sm:$0xff] }
 0x1df   : > { %v664_v57 = vmax.f32 %v657_v54, 0.0  ;;  %v722_v54 = vld [vmem:[%s2535_s4] sm:$0xff] }
 0x1e4   : > { %v659_v55 = vpop.f32.mrf.mxu0 }
 0x1e5   : > { %v660_v56 = vadd.f32 %v659_v55, %v618_v42  ;;  %v725_v55 = vld [vmem:[%s2535_s4 + $0x18] sm:$0xff] }
 0x1e7   : > { %v665_v58 = vmax.f32 %v660_v56, 0.0  ;;  %v724_v56 = vld [vmem:[%s2535_s4 + $0x10] sm:$0xff] }
 0x1e9   : > { %v1591_v59 = vpack.i.bf16 %v664_v57, %v665_v58  ;;  %v727_v57 = vld [vmem:[%s2535_s4 + $0x28] sm:$0xff]  ;;  %v726_v58 = vld [vmem:[%s2535_s4 + $0x20] sm:$0xff] }
 0x1eb   : > { %1592 = vrot.lane.b32.xlu1 %v1591_v59, %s2108_s27  ;;  %v729_v59 = vld [vmem:[%s2535_s4 + $0x38] sm:$0xff] }
 0x235   : > { %v1598_v60 = vpop.permute.xlu2 %1597 }
 0x236   : > { %v1600_v61 = vunpack.i.h.bf16 %v1598_v60  ;;  %v1599_v62 = vunpack.i.l.bf16 %v1598_v60  ;;  %v728_v60 = vld [vmem:[%s2535_s4 + $0x30] sm:$0xff] }
 0x238   : > { %v682_v63 = vsel %vm2308_vm3, %v1600_v61, 0.0  ;;  %v683_v0 = vsel %vm2308_vm3, %v1599_v62, 0.0 }
 0x239   : > { %v1606_v1 = vpack.i.bf16 %v682_v63, %v683_v0 }
 0x23b   : > { %1607 = vrot.lane.b32.xlu1 %v1606_v1, %s2109_s28 }
 0x25d   : > { %v1593_v2 = vpop.permute.xlu1 %1592 }
 0x25e   : > { %v1595_v3 = vunpack.i.h.bf16 %v1593_v2  ;;  %v1594_v4 = vunpack.i.l.bf16 %v1593_v2 }
 0x260   : > { %v684_v5 = vsel %vm2308_vm3, %v1595_v3, 0.0  ;;  %v685_v6 = vsel %vm2308_vm3, %v1594_v4, 0.0 }
 0x261   : > { %v1601_v7 = vpack.i.bf16 %v684_v5, %v685_v6 }
 0x263   : > { %1602 = vrot.lane.b32.xlu0 %v1601_v7, %s2109_s28  ;;  %1612 = vrot.lane.b32.xlu2 %v1601_v7, %s2105_s16 }
 0x264   : > { %1627 = vrot.lane.b32.xlu1 %v1601_v7, %s2107_s29 }
 0x26b   : > { %1622 = vrot.lane.b32.xlu2 %v1606_v1, %s2107_s29  ;;  %1617 = vrot.lane.b32.xlu0 %v1606_v1, %s2105_s16 }
 0x26c   : > { %1637 = vrot.lane.b32.xlu1 %v1606_v1, %s2110_s26 }
 0x273   : > { %1632 = vrot.lane.b32.xlu0 %v1601_v7, %s2110_s26 }
 0x2ad   : > { %v1608_v8 = vpop.permute.xlu1 %1607 }
 0x2ae   : > { %1647 = vrot.lane.b32.xlu0 %v1608_v8, %s2107_s29 }
 0x2bd   : > { %v1613_v9 = vpop.permute.xlu2 %1612 }
 0x2be   : > { %1652 = vrot.lane.b32.xlu1 %v1613_v9, %s2107_s29 }
 0x2c5   : > { %v2362_v17 = vpop.permute.xlu2 %1622 }
 0x2c6   : > { %v1625_v19 = vunpack.i.h.bf16 %v2362_v17  ;;  %v1624_v20 = vunpack.i.l.bf16 %v2362_v17 }
 0x2d5   : > { %v1603_v11 = vpop.permute.xlu0 %1602 }
 0x2d6   : > { %v2354_v12 = vpop.permute.xlu1 %1627  ;;  %1642 = vrot.lane.b32.xlu2 %v1603_v11, %s2107_s29 }
 0x2d7   : > { %v1630_v13 = vunpack.i.h.bf16 %v2354_v12  ;;  %v1629_v14 = vunpack.i.l.bf16 %v2354_v12  ;;  %1662 = vrot.lane.b32.xlu0 %v2354_v12, %s2107_s29 }
 0x2dd   : > { %v1618_v15 = vpop.permute.xlu0 %1617 }
 0x2de   : > { %v1638_v16 = vpop.permute.xlu1 %1637  ;;  %1657 = vrot.lane.b32.xlu2 %v1618_v15, %s2107_s29 }
 0x2df   : > { %1677 = vrot.lane.b32.xlu0 %v1638_v16, %s2107_s29 }
 0x2e5   : > { %v1633_v18 = vpop.permute.xlu0 %1632 }
 0x2e6   : > { %v1635_v21 = vunpack.i.h.bf16 %v1633_v18  ;;  %v1634_v22 = vunpack.i.l.bf16 %v1633_v18 }
 0x2e7   : > { %741 = vperm.xlu0 %1568, %v731_v25  }
 0x2e8   : > { %v1671_v23 = vpack.i.bf16 %v1635_v21, %v1625_v19  ;;  %v1666_v24 = vpack.i.bf16 %v1634_v22, %v1624_v20 }
 0x2ea   : > { %1672 = vrot.lane.b32.xlu2 %v1671_v23, %s2107_s29  ;;  %1667 = vrot.lane.b32.xlu1 %v1666_v24, %s2107_s29  ;;  %s2111_s29 = smov 6  }
 0x2f2   : > { %746 = vperm.xlu2 %1590, %v732_v26   ;;  %751 = vperm.xlu1 %1589, %v733_v27  }
 0x2fa   : > { %736 = vperm.xlu1 %1589, %v730_v28  }
 0x320   : > { %v1648_v31 = vpop.permute.xlu0 %1647 }
 0x321   : > { %v1649_v33 = vunpack.i.l.bf16 %v1648_v31  ;;  %v1650_v35 = vunpack.i.h.bf16 %v1648_v31 }
 0x330   : > { %v1643_v29 = vpop.permute.xlu2 %1642  ;;  %v1653_v34 = vpop.permute.xlu1 %1652 }
 0x331   : > { %v1644_v30 = vunpack.i.l.bf16 %v1643_v29  ;;  %v1645_v32 = vunpack.i.h.bf16 %v1643_v29  ;;  %v1654_v36 = vunpack.i.l.bf16 %v1653_v34  ;;  %v1655_v38 = vunpack.i.h.bf16 %v1653_v34 }
 0x333   : > { %819 = vmatpush.msra.mxu1 %v1644_v30 }
 0x335   : > { %820 = vmatpush.msra.mxu1 %v1645_v32 }
 0x337   : > { %821 = vmatpush.msra.mxu1 %v1649_v33 }
 0x338   : > { %v1658_v37 = vpop.permute.xlu2 %1657 }
 0x339   : > { %822 = vmatpush.msra.mxu1 %v1650_v35  ;;  %v1659_v39 = vunpack.i.l.bf16 %v1658_v37  ;;  %v1660_v40 = vunpack.i.h.bf16 %v1658_v37 }
 0x33b   : > { %823 = vmatpush.msra.mxu1 %v1654_v36 }
 0x33d   : > { %824 = vmatpush.msra.mxu1 %v1655_v38 }
 0x33f   : > { %825 = vmatpush.msra.mxu1 %v1659_v39 }
 0x341   : > { %826 = vmatpush.msra.mxu1 %v1660_v40 }
 0x344   : > { %v1673_v44 = vpop.permute.xlu2 %1672 }
 0x345   : > { %v1674_v49 = vunpack.i.l.bf16 %v1673_v44  ;;  %v1675_v50 = vunpack.i.h.bf16 %v1673_v44 }
 0x349   : > { %v1663_v41 = vpop.permute.xlu0 %1662 }
 0x34a   : > { %v1664_v42 = vunpack.i.l.bf16 %v1663_v41  ;;  %v1665_v43 = vunpack.i.h.bf16 %v1663_v41 }
 0x34c   : > { %827 = vmatpush.msra.mxu1 %v1664_v42 }
 0x34e   : > { %828 = vmatpush.msra.mxu1 %v1665_v43 }
 0x351   : > { %v1678_v48 = vpop.permute.xlu0 %1677 }
 0x352   : > { %v1679_v51 = vunpack.i.l.bf16 %v1678_v48  ;;  %v1680_v52 = vunpack.i.h.bf16 %v1678_v48  ;;  %v947_v48 = vld [vmem:[%s2540_s9 + $0x10] sm:$0xff] }
 0x359   : > { %v742_v2 = vpop.permute.xlu0 %741 }
 0x35c   : > { %v1668_v45 = vpop.permute.xlu1 %1667 }
 0x35d   : > { %v1669_v46 = vunpack.i.l.bf16 %v1668_v45  ;;  %v1670_v47 = vunpack.i.h.bf16 %v1668_v45 }
 0x35f   : > { %829 = vmatpush.msra.mxu1 %v1669_v46  ;;  %860 = vmatpush.msra.mxu2 %v1670_v47 }
 0x361   : > { %830 = vmatpush.msra.mxu1 %v1674_v49  ;;  %861 = vmatpush.msra.mxu2 %v1675_v50  ;;  %v948_v49 = vld [vmem:[%s2540_s9 + $0x18] sm:$0xff]  ;;  %v946_v50 = vld [vmem:[%s2540_s9 + $0x8] sm:$0xff] }
 0x363   : > { %831 = vmatpush.msra.mxu1 %v1629_v14  ;;  %862 = vmatpush.msra.mxu2 %v1679_v51  ;;  %v747_v14 = vpop.permute.xlu2 %746  ;;  %v945_v51 = vld [vmem:[%s2540_s9] sm:$0xff] }
 0x364   : > { %v752_v61 = vpop.permute.xlu1 %751 }
 0x365   : > { %832 = vmatpush.msra.mxu1 %v1630_v13  ;;  %863 = vmatpush.msra.mxu2 %v1680_v52 }
 0x366   : > { %1447 = vmatmul.msk.f32.vlgmr.msra.gmra.mxu2 %vm806_vm6, %v723_v53 }
 0x367   : > { %833 = vmatpush.msra.mxu1 %v1624_v20 }
 0x369   : > { %834 = vmatpush.msra.mxu1 %v1625_v19 }
 0x36a   : > { %835 = vmatmul.f32.vlgmr.msra.gmra.mxu1 %v722_v54 }
 0x36c   : > { %v737_v0 = vpop.permute.xlu1 %736 }
 0x36e   : > { %1448 = vmatmul.msk.f32.gmra.mxu2 %vm806_vm6, %v725_v55 }
 0x372   : > { %838 = vmatmul.f32.gmra.mxu1 %v724_v56 }
 0x376   : > { %1449 = vmatmul.msk.f32.gmra.mxu2 %vm806_vm6, %v727_v57 }
 0x37a   : > { %841 = vmatmul.f32.gmra.mxu1 %v726_v58 }
 0x37e   : > { %1450 = vmatmul.msk.f32.gmra.mxu2 %vm806_vm6, %v729_v59 }
 0x382   : > { %844 = vmatmul.f32.gmra.mxu1 %v728_v60 }
 0x3e7   : > { %v836_v62 = vpop.f32.mrf.mxu1 }
 0x3e8   : > { %v837_v1 = vadd.f32 %v836_v62, %v737_v0 }
 0x3e9   : > { %v865_v63 = vpop.f32.mrf.mxu2 }
 0x3ea   : > { %v866_v4 = vadd.f32 %v865_v63, %v837_v1 }
 0x3ec   : > { %v877_v8 = vmax.f32 %v866_v4, 0.0 }
 0x3ef   : > { %v839_v3 = vpop.f32.mrf.mxu1 }
 0x3f0   : > { %v840_v5 = vadd.f32 %v839_v3, %v742_v2 }
 0x3f1   : > { %v868_v6 = vpop.f32.mrf.mxu2 }
 0x3f2   : > { %v869_v7 = vadd.f32 %v868_v6, %v840_v5 }
 0x3f4   : > { %v878_v9 = vmax.f32 %v869_v7, 0.0 }
 0x3f6   : > { %v1686_v11 = vpack.i.bf16 %v877_v8, %v878_v9 }
 0x3f7   : > { %v842_v12 = vpop.f32.mrf.mxu1 }
 0x3f8   : > { %1687 = vrot.lane.b32.xlu0 %v1686_v11, %s2111_s29  ;;  %v843_v15 = vadd.f32 %v842_v12, %v747_v14 }
 0x3f9   : > { %v871_v13 = vpop.f32.mrf.mxu2 }
 0x3fa   : > { %v872_v17 = vadd.f32 %v871_v13, %v843_v15 }
 0x3fc   : > { %v879_v21 = vmax.f32 %v872_v17, 0.0  ;;  %v938_v17 = vld [vmem:[%s2573_s23 + $0x8] sm:$0xff] }
 0x3ff   : > { %v845_v16 = vpop.f32.mrf.mxu1 }
 0x400   : > { %v846_v18 = vadd.f32 %v845_v16, %v752_v61 }
 0x401   : > { %v874_v19 = vpop.f32.mrf.mxu2 }
 0x402   : > { %v875_v20 = vadd.f32 %v874_v19, %v846_v18 }
 0x404   : > { %v880_v22 = vmax.f32 %v875_v20, 0.0  ;;  %v937_v20 = vld [vmem:[%s2573_s23] sm:$0xff] }
 0x406   : > { %v1681_v23 = vpack.i.bf16 %v879_v21, %v880_v22  ;;  %v940_v21 = vld [vmem:[%s2573_s23 + $0x18] sm:$0xff]  ;;  %v939_v22 = vld [vmem:[%s2573_s23 + $0x10] sm:$0xff] }
 0x408   : > { %1682 = vrot.lane.b32.xlu2 %v1681_v23, %s2111_s29  ;;  %v942_v23 = vld [vmem:[%s2573_s23 + $0x28] sm:$0xff] }
 0x462   : > { %v1683_v24 = vpop.permute.xlu2 %1682 }
 0x463   : > { %v1685_v25 = vunpack.i.h.bf16 %v1683_v24  ;;  %v1684_v26 = vunpack.i.l.bf16 %v1683_v24  ;;  %v941_v24 = vld [vmem:[%s2573_s23 + $0x20] sm:$0xff] }
 0x465   : > { %v899_v27 = vsel %vm2308_vm3, %v1685_v25, 0.0  ;;  %v900_v28 = vsel %vm2308_vm3, %v1684_v26, 0.0  ;;  %v944_v25 = vld [vmem:[%s2573_s23 + $0x38] sm:$0xff]  ;;  %v943_v26 = vld [vmem:[%s2573_s23 + $0x30] sm:$0xff] }
 0x466   : > { %v1691_v29 = vpack.i.bf16 %v899_v27, %v900_v28 }
 0x468   : > { %1692 = vrot.lane.b32.xlu1 %v1691_v29, %s2112_s3  ;;  %1702 = vrot.lane.b32.xlu0 %v1691_v29, %s2110_s26 }
 0x46a   : > { %v1688_v30 = vpop.permute.xlu0 %1687 }
 0x46b   : > { %v1690_v31 = vunpack.i.h.bf16 %v1688_v30  ;;  %v1689_v32 = vunpack.i.l.bf16 %v1688_v30 }
 0x46d   : > { %v897_v33 = vsel %vm2308_vm3, %v1690_v31, 0.0  ;;  %v898_v34 = vsel %vm2308_vm3, %v1689_v32, 0.0 }
 0x46e   : > { %v1716_v35 = vpack.i.bf16 %v897_v33, %v898_v34 }
 0x470   : > { %1717 = vrot.lane.b32.xlu0 %v1716_v35, %s2105_s16  ;;  %1707 = vrot.lane.b32.xlu1 %v1716_v35, %s2110_s26 }
 0x471   : > { %1697 = vrot.lane.b32.xlu2 %v1716_v35, %s2112_s3 }
 0x478   : > { %1722 = vrot.lane.b32.xlu1 %v1691_v29, %s2113_s10 }
 0x479   : > { %1712 = vrot.lane.b32.xlu2 %v1691_v29, %s2105_s16  ;;  %s2575_s16 = sld [smem:[#allocation27_spill]] }
 0x47f   : > { %s1283_s17 = scalar_lea.hbm %s2575_s16, %s1457_s30  ;;  %s2021_s11 = scalar_lea.hbm %s2575_s16, 16 }
 0x480   : > { %s1287_s27 = sshll.u32 %s1283_s17, 4  ;;  %s1288_s27 = int_to_ptr.hbm [resolvable:$true] %s1287_s27 }
 0x481   : > { %1727 = vrot.lane.b32.xlu2 %v1716_v35, %s2113_s10  ;;  %s2015_s13 = sshra.s32 %s1288_s27, 4  ;;  %s2016_s13 = int_to_ptr.hbm [resolvable:$true] %s2015_s13 }
 0x482   : > { %s2017_s20 = scalar_lea.hbm %s2016_s13, 8  ;;  %p2022_p11 = scmp.lt.s32.totalorder %s2016_s13, %s2575_s16 }
 0x483   : > { %p2018_p1 = scmp.ne.s32.totalorder %s2016_s13, %s2017_s20  ;;  %p2023_p12 = scmp.lt.s32.totalorder %s2021_s11, %s2017_s20 }
 0x485   : > { %p2019_p9 = pnand %p2018_p1, %p2252_p2  ;;  %p2024_p13 = por %p2023_p12, %p2022_p11 }
 0x487   : > { %p2020_p10 = pneg %p2019_p9 }
 0x489   : > { %p2025_p0 = pnand %p2024_p13, %p2020_p10 }
 0x4cb   : > { %v1698_v36 = vpop.permute.xlu2 %1697 }
 0x4cc   : > { %1737 = vrot.lane.b32.xlu1 %v1698_v36, %s2109_s28 }
 0x4d3   : > { %v1713_v37 = vpop.permute.xlu2 %1712 }
 0x4d4   : > { %1752 = vrot.lane.b32.xlu1 %v1713_v37, %s2109_s28 }
 0x4da   : > { %v1693_v38 = vpop.permute.xlu1 %1692  ;;  %v1703_v39 = vpop.permute.xlu0 %1702 }
 0x4db   : > { %1732 = vrot.lane.b32.xlu0 %v1693_v38, %s2109_s28  ;;  %1742 = vrot.lane.b32.xlu2 %v1703_v39, %s2109_s28  ;;  %v1728_v47 = vpop.permute.xlu2 %1727 }
 0x4e2   : > { %v1718_v40 = vpop.permute.xlu0 %1717  ;;  %v1708_v41 = vpop.permute.xlu1 %1707 }
 0x4e3   : > { %1747 = vrot.lane.b32.xlu0 %v1708_v41, %s2109_s28  ;;  %1757 = vrot.lane.b32.xlu2 %v1718_v40, %s2109_s28 }
 0x4ea   : > { %v1723_v42 = vpop.permute.xlu1 %1722 }
 0x4eb   : > { %v1725_v43 = vunpack.i.h.bf16 %v1723_v42  ;;  %v1724_v44 = vunpack.i.l.bf16 %v1723_v42  ;;  %1762 = vrot.lane.b32.xlu0 %v1691_v29, %s2109_s28 }
 0x4ed   : > { %v1771_v45 = vpack.i.bf16 %v897_v33, %v1725_v43  ;;  %v1766_v46 = vpack.i.bf16 %v898_v34, %v1724_v44 }
 0x4ef   : > { %1772 = vrot.lane.b32.xlu2 %v1771_v45, %s2109_s28  ;;  %1767 = vrot.lane.b32.xlu1 %v1766_v46, %s2109_s28 }
 0x4f3   : > { %1777 = vrot.lane.b32.xlu0 %v1728_v47, %s2109_s28  ;;  %s2114_s28 = smov 14  }
 0x4f7   : > { %961 = vperm.xlu2 %1590, %v947_v48   ;;  %966 = vperm.xlu1 %1589, %v948_v49  }
 0x4fb   : > { %956 = vperm.xlu0 %1568, %v946_v50  }
 0x4ff   : > { %951 = vperm.xlu1 %1589, %v945_v51  }
 0x535   : > { %v1743_v52 = vpop.permute.xlu2 %1742 }
 0x536   : > { %v1744_v62 = vunpack.i.l.bf16 %v1743_v52  ;;  %v1745_v63 = vunpack.i.h.bf16 %v1743_v52 }
 0x53d   : > { %v1758_v58 = vpop.permute.xlu2 %1757 }
 0x53e   : > { %v1738_v53 = vpop.permute.xlu1 %1737  ;;  %v1759_v9 = vunpack.i.l.bf16 %v1758_v58  ;;  %v1760_v11 = vunpack.i.h.bf16 %v1758_v58 }
 0x53f   : > { %v1739_v57 = vunpack.i.l.bf16 %v1738_v53  ;;  %v1740_v59 = vunpack.i.h.bf16 %v1738_v53 }
 0x546   : > { %v1753_v61 = vpop.permute.xlu1 %1752 }
 0x547   : > { %v1754_v5 = vunpack.i.l.bf16 %v1753_v61  ;;  %v1755_v7 = vunpack.i.h.bf16 %v1753_v61 }
 0x549   : > { %v1773_v3 = vpop.permute.xlu2 %1772 }
 0x54a   : > { %v1774_v8 = vunpack.i.l.bf16 %v1773_v3  ;;  %v1775_v19 = vunpack.i.h.bf16 %v1773_v3 }
 0x54d   : > { %v1733_v54 = vpop.permute.xlu0 %1732 }
 0x54e   : > { %v1734_v55 = vunpack.i.l.bf16 %v1733_v54  ;;  %v1735_v56 = vunpack.i.h.bf16 %v1733_v54 }
 0x550   : > { %1041 = vmatpush.msra.mxu3 %v1734_v55 }
 0x551   : > { %v962_v43 = vpop.permute.xlu2 %961 }
 0x552   : > { %1042 = vmatpush.msra.mxu3 %v1735_v56 }
 0x554   : > { %1043 = vmatpush.msra.mxu3 %v1739_v57 }
 0x555   : > { %v1748_v60 = vpop.permute.xlu0 %1747 }
 0x556   : > { %1044 = vmatpush.msra.mxu3 %v1740_v59  ;;  %v1749_v0 = vunpack.i.l.bf16 %v1748_v60  ;;  %v1750_v1 = vunpack.i.h.bf16 %v1748_v60 }
 0x558   : > { %1045 = vmatpush.msra.mxu3 %v1744_v62 }
 0x55a   : > { %1046 = vmatpush.msra.mxu3 %v1745_v63 }
 0x55c   : > { %1047 = vmatpush.msra.mxu3 %v1749_v0 }
 0x55d   : > { %v1763_v2 = vpop.permute.xlu0 %1762 }
 0x55e   : > { %1048 = vmatpush.msra.mxu3 %v1750_v1  ;;  %v1764_v13 = vunpack.i.l.bf16 %v1763_v2  ;;  %v1765_v15 = vunpack.i.h.bf16 %v1763_v2 }
 0x560   : > { %1049 = vmatpush.msra.mxu3 %v1754_v5 }
 0x561   : > { %v1768_v4 = vpop.permute.xlu1 %1767 }
 0x562   : > { %v1769_v6 = vunpack.i.l.bf16 %v1768_v4  ;;  %1050 = vmatpush.msra.mxu3 %v1755_v7  ;;  %v1770_v18 = vunpack.i.h.bf16 %v1768_v4 }
 0x564   : > { %1082 = vmatpush.msrb.mxu2 %v1769_v6  ;;  %1051 = vmatpush.msra.mxu3 %v1759_v9 }
 0x565   : > { %v1778_v12 = vpop.permute.xlu0 %1777 }
 0x566   : > { %1083 = vmatpush.msrb.mxu2 %v1774_v8  ;;  %1052 = vmatpush.msra.mxu3 %v1760_v11  ;;  %v1779_v14 = vunpack.i.l.bf16 %v1778_v12  ;;  %v1780_v16 = vunpack.i.h.bf16 %v1778_v12 }
 0x568   : > { %1053 = vmatpush.msra.mxu3 %v1764_v13  ;;  %1084 = vmatpush.msrb.mxu2 %v1779_v14  ;;  %v1161_v13 = vld [vmem:[%s2574_s25] sm:$0xff] }
 0x569   : > { %v967_v27 = vpop.permute.xlu1 %966 }
 0x56a   : > { %1054 = vmatpush.msra.mxu3 %v1765_v15  ;;  %1085 = vmatpush.msrb.mxu2 %v1780_v16 }
 0x56b   : > { %1451 = vmatmul.msk.f32.vlgmr.msrb.gmra.mxu2 %vm806_vm6, %v938_v17 }
 0x56c   : > { %1055 = vmatpush.msra.mxu3 %v1770_v18 }
 0x56d   : > { %v957_v33 = vpop.permute.xlu0 %956 }
 0x56e   : > { %1056 = vmatpush.msra.mxu3 %v1775_v19 }
 0x56f   : > { %1057 = vmatmul.f32.vlgmr.msra.gmra.mxu3 %v937_v20 }
 0x571   : > { %v952_v30 = vpop.permute.xlu1 %951 }
 0x573   : > { %1452 = vmatmul.msk.f32.gmra.mxu2 %vm806_vm6, %v940_v21 }
 0x577   : > { %1060 = vmatmul.f32.gmra.mxu3 %v939_v22 }
 0x57b   : > { %1453 = vmatmul.msk.f32.gmra.mxu2 %vm806_vm6, %v942_v23 }
 0x57f   : > { %1063 = vmatmul.f32.gmra.mxu3 %v941_v24 }
 0x583   : > { %1454 = vmatmul.msk.f32.gmra.mxu2 %vm806_vm6, %v944_v25 }
 0x587   : > { %1066 = vmatmul.f32.gmra.mxu3 %v943_v26 }
 0x5ee   : > { %v1087_v28 = vpop.f32.mrf.mxu2 }
 0x5f2   : > { %v1058_v29 = vpop.f32.mrf.mxu3 }
 0x5f3   : > { %v1059_v32 = vadd.f32 %v1058_v29, %v952_v30 }
 0x5f5   : > { %v1088_v35 = vadd.f32 %v1087_v28, %v1059_v32 }
 0x5f6   : > { %v1090_v31 = vpop.f32.mrf.mxu2 }
 0x5f7   : > { %v1099_v38 = vmax.f32 %v1088_v35, 0.0 }
 0x5fa   : > { %v1061_v34 = vpop.f32.mrf.mxu3 }
 0x5fb   : > { %v1062_v36 = vadd.f32 %v1061_v34, %v957_v33 }
 0x5fd   : > { %v1091_v37 = vadd.f32 %v1090_v31, %v1062_v36 }
 0x5fe   : > { %v1093_v40 = vpop.f32.mrf.mxu2 }
 0x5ff   : > { %v1100_v39 = vmax.f32 %v1091_v37, 0.0 }
 0x601   : > { %v1786_v41 = vpack.i.bf16 %v1099_v38, %v1100_v39 }
 0x602   : > { %v1064_v42 = vpop.f32.mrf.mxu3 }
 0x603   : > { %1787 = vrot.lane.b32.xlu0 %v1786_v41, %s2114_s28  ;;  %v1065_v44 = vadd.f32 %v1064_v42, %v962_v43  ;;  %v1160_v42 = vld [vmem:[#allocation8 + $0x8] sm:$0xff] }
 0x605   : > { %v1094_v47 = vadd.f32 %v1093_v40, %v1065_v44 }
 0x606   : > { %v1096_v46 = vpop.f32.mrf.mxu2 }
 0x607   : > { %v1101_v50 = vmax.f32 %v1094_v47, 0.0 }
 0x60a   : > { %v1067_v45 = vpop.f32.mrf.mxu3 }
 0x60b   : > { %v1068_v48 = vadd.f32 %v1067_v45, %v967_v27  ;;  %v1159_v45 = vld [vmem:[#allocation8] sm:$0xff] }
 0x60d   : > { %v1097_v49 = vadd.f32 %v1096_v46, %v1068_v48 }
 0x60f   : > { %v1102_v51 = vmax.f32 %v1097_v49, 0.0 }
 0x611   : > { %v1781_v52 = vpack.i.bf16 %v1101_v50, %v1102_v51 }
 0x613   : > { %1782 = vrot.lane.b32.xlu2 %v1781_v52, %s2114_s28 }
 0x66d   : > { %v1783_v53 = vpop.permute.xlu2 %1782 }
 0x66e   : > { %v1785_v54 = vunpack.i.h.bf16 %v1783_v53  ;;  %v1784_v55 = vunpack.i.l.bf16 %v1783_v53 }
 0x670   : > { %v1121_v56 = vsel %vm2308_vm3, %v1785_v54, 0.0  ;;  %v1122_v57 = vsel %vm2308_vm3, %v1784_v55, 0.0 }
 0x671   : > { %v1791_v58 = vpack.i.bf16 %v1121_v56, %v1122_v57 }
 0x673   : > { %1792 = vrot.lane.b32.xlu1 %v1791_v58, %s2115_s14  ;;  %1802 = vrot.lane.b32.xlu0 %v1791_v58, %s2113_s10 }
 0x675   : > { %v1788_v59 = vpop.permute.xlu0 %1787 }
 0x676   : > { %v1790_v60 = vunpack.i.h.bf16 %v1788_v59  ;;  %v1789_v61 = vunpack.i.l.bf16 %v1788_v59 }
 0x678   : > { %v1119_v62 = vsel %vm2308_vm3, %v1790_v60, 0.0  ;;  %v1120_v63 = vsel %vm2308_vm3, %v1789_v61, 0.0 }
 0x679   : > { %v1816_v0 = vpack.i.bf16 %v1119_v62, %v1120_v63 }
 0x67b   : > { %1817 = vrot.lane.b32.xlu0 %v1816_v0, %s2110_s26  ;;  %1807 = vrot.lane.b32.xlu1 %v1816_v0, %s2113_s10 }
 0x67c   : > { %1797 = vrot.lane.b32.xlu2 %v1816_v0, %s2115_s14 }
 0x683   : > { %1822 = vrot.lane.b32.xlu1 %v1791_v58, %s2116_s15 }
 0x684   : > { %1812 = vrot.lane.b32.xlu2 %v1791_v58, %s2110_s26 }
 0x68c   : > { %1827 = vrot.lane.b32.xlu2 %v1816_v0, %s2116_s15 }
 0x6d6   : > { %v1798_v1 = vpop.permute.xlu2 %1797 }
 0x6d7   : > { %1837 = vrot.lane.b32.xlu1 %v1798_v1, %s2117_s24 }
 0x6de   : > { %v1813_v2 = vpop.permute.xlu2 %1812 }
 0x6df   : > { %1852 = vrot.lane.b32.xlu1 %v1813_v2, %s2117_s24 }
 0x6e5   : > { %v1793_v3 = vpop.permute.xlu1 %1792  ;;  %v1803_v4 = vpop.permute.xlu0 %1802 }
 0x6e6   : > { %1832 = vrot.lane.b32.xlu0 %v1793_v3, %s2117_s24  ;;  %1842 = vrot.lane.b32.xlu2 %v1803_v4, %s2117_s24  ;;  %v1828_v12 = vpop.permute.xlu2 %1827 }
 0x6ed   : > { %v1818_v10 = vpop.permute.xlu0 %1817  ;;  %v1808_v5 = vpop.permute.xlu1 %1807 }
 0x6ee   : > { %1847 = vrot.lane.b32.xlu0 %v1808_v5, %s2117_s24  ;;  %1857 = vrot.lane.b32.xlu2 %v1818_v10, %s2117_s24 }
 0x6f5   : > { %v1823_v6 = vpop.permute.xlu1 %1822 }
 0x6f6   : > { %v1825_v7 = vunpack.i.h.bf16 %v1823_v6  ;;  %v1824_v8 = vunpack.i.l.bf16 %v1823_v6  ;;  %1862 = vrot.lane.b32.xlu0 %v1791_v58, %s2117_s24 }
 0x6f8   : > { %v1871_v9 = vpack.i.bf16 %v1119_v62, %v1825_v7  ;;  %v1866_v11 = vpack.i.bf16 %v1120_v63, %v1824_v8 }
 0x6fa   : > { %1872 = vrot.lane.b32.xlu2 %v1871_v9, %s2117_s24  ;;  %1867 = vrot.lane.b32.xlu1 %v1866_v11, %s2117_s24 }
 0x6fe   : > { %1877 = vrot.lane.b32.xlu0 %v1828_v12, %s2117_s24 }
 0x702   : > { %1164 = vperm.xlu1 %1589, %v1161_v13  }
 0x740   : > { %v1843_v14 = vpop.permute.xlu2 %1842 }
 0x741   : > { %v1844_v24 = vunpack.i.l.bf16 %v1843_v14  ;;  %v1845_v25 = vunpack.i.h.bf16 %v1843_v14 }
 0x748   : > { %v1858_v20 = vpop.permute.xlu2 %1857 }
 0x749   : > { %v1838_v15 = vpop.permute.xlu1 %1837  ;;  %v1859_v35 = vunpack.i.l.bf16 %v1858_v20  ;;  %v1860_v36 = vunpack.i.h.bf16 %v1858_v20 }
 0x74a   : > { %v1839_v19 = vunpack.i.l.bf16 %v1838_v15  ;;  %v1840_v21 = vunpack.i.h.bf16 %v1838_v15 }
 0x751   : > { %v1853_v23 = vpop.permute.xlu1 %1852 }
 0x752   : > { %v1854_v31 = vunpack.i.l.bf16 %v1853_v23  ;;  %v1855_v33 = vunpack.i.h.bf16 %v1853_v23 }
 0x754   : > { %v1873_v29 = vpop.permute.xlu2 %1872 }
 0x755   : > { %v1874_v34 = vunpack.i.l.bf16 %v1873_v29  ;;  %v1875_v44 = vunpack.i.h.bf16 %v1873_v29 }
 0x758   : > { %v1833_v16 = vpop.permute.xlu0 %1832 }
 0x759   : > { %v1834_v17 = vunpack.i.l.bf16 %v1833_v16  ;;  %v1835_v18 = vunpack.i.h.bf16 %v1833_v16 }
 0x75b   : > { %1230 = vmatpush.msrb.mxu0 %v1834_v17 }
 0x75d   : > { %1231 = vmatpush.msrb.mxu0 %v1835_v18 }
 0x75f   : > { %1232 = vmatpush.msrb.mxu0 %v1839_v19 }
 0x760   : > { %v1848_v22 = vpop.permute.xlu0 %1847 }
 0x761   : > { %1233 = vmatpush.msrb.mxu0 %v1840_v21  ;;  %v1849_v26 = vunpack.i.l.bf16 %v1848_v22  ;;  %v1850_v27 = vunpack.i.h.bf16 %v1848_v22 }
 0x763   : > { %1234 = vmatpush.msrb.mxu0 %v1844_v24 }
 0x765   : > { %1235 = vmatpush.msrb.mxu0 %v1845_v25 }
 0x767   : > { %1236 = vmatpush.msrb.mxu0 %v1849_v26 }
 0x768   : > { %v1863_v28 = vpop.permute.xlu0 %1862 }
 0x769   : > { %1237 = vmatpush.msrb.mxu0 %v1850_v27  ;;  %v1864_v39 = vunpack.i.l.bf16 %v1863_v28  ;;  %v1865_v41 = vunpack.i.h.bf16 %v1863_v28 }
 0x76b   : > { %1238 = vmatpush.msrb.mxu0 %v1854_v31 }
 0x76c   : > { %v1868_v30 = vpop.permute.xlu1 %1867 }
 0x76d   : > { %v1869_v32 = vunpack.i.l.bf16 %v1868_v30  ;;  %1239 = vmatpush.msrb.mxu0 %v1855_v33  ;;  %v1870_v43 = vunpack.i.h.bf16 %v1868_v30 }
 0x76f   : > { %1262 = vmatpush.msrb.mxu1 %v1869_v32  ;;  %1240 = vmatpush.msrb.mxu0 %v1859_v35 }
 0x770   : > { %v1878_v37 = vpop.permute.xlu0 %1877 }
 0x771   : > { %1263 = vmatpush.msrb.mxu1 %v1874_v34  ;;  %v1879_v38 = vunpack.i.l.bf16 %v1878_v37  ;;  %1241 = vmatpush.msrb.mxu0 %v1860_v36  ;;  %v1880_v40 = vunpack.i.h.bf16 %v1878_v37 }
 0x773   : > { %1242 = vmatpush.msrb.mxu0 %v1864_v39  ;;  %1264 = vmatpush.msrb.mxu1 %v1879_v38 }
 0x774   : > { %v1165_v46 = vpop.permute.xlu1 %1164 }
 0x775   : > { %1243 = vmatpush.msrb.mxu0 %v1865_v41  ;;  %1265 = vmatpush.msrb.mxu1 %v1880_v40 }
 0x776   : > { %1455 = vmatmul.msk.f32.vlgmr.msrb.gmra.mxu1 %vm806_vm6, %v1160_v42 }
 0x777   : > { %1244 = vmatpush.msrb.mxu0 %v1870_v43 }
 0x779   : > { %1245 = vmatpush.msrb.mxu0 %v1875_v44 }
 0x77a   : > { %1246 = vmatmul.f32.vlgmr.msrb.gmra.mxu0 %v1159_v45 }
 0x7f3   : > { %v1267_v48 = vpop.f32.mrf.mxu1 }
 0x7f7   : > { %v1247_v47 = vpop.f32.mrf.mxu0 }
 0x7f8   : > { %v1248_v49 = vadd.f32 %v1247_v47, %v1165_v46 }
 0x7fa   : > { %v1268_v50 = vadd.f32 %v1267_v48, %v1248_v49 }
 0x7fc   : > { %1270 = vst.msk [vmem:[%s508_s19] sm:$0xff] %vm806_vm6, %v1268_v50 }
 0x7fd   : > { %2028 = shalt.err (!%p2025_p0)
}
 0x7fe   : > { %1473 = dma.vmem_to_hbm [thread:$0]  (%p2252_p2), %s1286_s21, 128, %s1288_s27, %s1272_s12  }
 0x7ff PF: > { %s2577_s6 = sld [smem:[#allocation16_spill]]  ;;  %p1490_p4 = pnand %p1428_p6, %p2259_p5 }
 0x801   : > { %p1491_p7 = pneg %p1490_p4 }
 0x805   : > { %s1299_s10 = sand.u32 1, %s2577_s6  }
 0x806   : > { %s1300_s25 = scalar_lea.sflag [#allocation4], %s1299_s10 }
 0x807   : > { %2070 = dma.done.wait (%p1491_p7), %s1300_s25, 128  }
 0x808   : > { %2072 = vsyncadd (%p1491_p7), %s1300_s25, 4294967168  ;;  %s31_s22 = sadd.s32 1, %s2095_s22   ;;  %s2579_s30 = sld [smem:[#allocation17_spill]] }
 0x809   : > { %p28_p8 = scmp.ge.s32.totalorder %s31_s22, 4   ;;  %s2580_s19 = sld [smem:[#allocation21_spill]] }
 0x80a   : > { %s2581_s20 = sld [smem:[#allocation18_spill]]  ;;  %s2583_s17 = smov %s2079_s18 }
 0x80b   : > { %s2582_s21 = sld [smem:[#allocation19_spill]]  ;;  %30 = sbr.rel (!%p28_p8) target bundleno = 15 (0xf), region = 133 }
 0x80e   : > { %s2584_s18 = smov %s2579_s30 }
 0x810   :  { %1306 = vsyncpa [#allocation3], 1 }
 0x811   :  { %1308 = vsyncpa [#allocation3 + $0x1], 1 }
 0x812   :  { %1309 = vsyncpa [#allocation6], 1 }
 0x813   :  { %1311 = vsyncpa [#allocation6 + $0x1], 1 }
 0x814   :  { %1312 = vsyncpa [#allocation9], 1 }
 0x815   :  { %1313 = vsyncpa [#allocation4], 1 }
 0x816   :  { %1315 = vsyncpa [#allocation4 + $0x1], 1 }

</bundles_post_ra>
